<compile_context>
chip_gen: v5e
topology: v5e:2x2
jax: 0.10.0
libtpu: 0.0.40
codegen_flags: <defaults>
</compile_context>

<pallas_src>
import jax
import jax.numpy as jnp
from jax import lax
from jax.experimental import pallas as pl
from jax.experimental.pallas import tpu as pltpu


def prior_generator_forward(mask_features, text_features, params):
    B, C, H, W = mask_features.shape
    text = text_features[:, :-1]                       # drop last prompt group
    _, T, P, Cemb = text.shape
    E = params["wq"].shape[0]
    Q = params["proto"].shape[0]

    CP = C + 1                                         # data channels + ones (bias) channel
    CPA = ((CP + 15) // 16) * 16                       # bf16 sublane-aligned channel count
    TPAD = ((T + 7) // 8) * 8                          # pad matmul M to 8 rows
    Wp = W + 2                                         # conv zero columns live in the layout
    Np = H * Wp                                        # padded flat spatial size (kernel-visible)
    L = ((Wp + 1 + 127) // 128) * 128                  # 128-aligned left flat pad (>= one row + 1)
    NPTOT = ((L + Np + Wp + 1 + 127) // 128) * 128     # total flat size, 128-aligned
    R = NPTOT - L - Np

    # ---------------- host-side layout plumbing (single bf16 mask copy) ----------------
    ones = jnp.ones((B, 1, H, W), mask_features.dtype)          # feat_proj-bias carrier channel
    maskb = jnp.concatenate([mask_features, ones], axis=1)      # (B, CP, H, W)
    maskb = jnp.pad(maskb, ((0, 0), (0, CPA - CP), (0, 0), (1, 1)))   # zero pad cols + channels
    maskp = maskb.reshape(B, CPA, Np)
    maskp = jnp.pad(maskp, ((0, 0), (0, 0), (L, R))).astype(jnp.bfloat16)   # (B, CPA, NPTOT)

    # ---------------- hoisted effective conv weights (tiny XLA einsum) ------------------
    # Wf[b,t,k,c] = sum_p w3[p, k] * sum_e text[b,t,p,e] * [wfp | bfp][e, c]
    wfp_aug = jnp.concatenate([params["wfp"], params["bfp"][:, None]], axis=1)   # (Cemb, CP)
    w3k = params["w3"].reshape(P, 9)                                             # k = (dy+1)*3+(dx+1)
    wf = jnp.einsum("pk,btpe,ec->btkc", w3k, text.astype(jnp.float32), wfp_aug)  # (B, T, 9, CP)
    wf = wf.at[:, :, 4, C].add(params["b3"][0])        # fold conv bias into centre-tap ones channel
    wf = jnp.pad(wf, ((0, 0), (0, TPAD - T), (0, 0), (0, CPA - CP)))
    wf = wf.reshape(B, TPAD, 9 * CPA).astype(jnp.bfloat16)                       # (B, TPAD, 9*CPA)

    # ------------------------------------ fused kernel ----------------------------------
    def kernel(maskp_ref, wf_ref, wq_ref, bq_ref, proto_ref,
               coarse_ref, anchors_ref, rhs_ref):
        # im2col: stack the 9 conv-tap shifted views of the single padded mask copy into
        # a (9*CPA, Np) bf16 scratch (all stores 16-sublane aligned, static offsets), then
        # ONE K-deep MXU matmul replaces 9 K=CP matmuls + 8 accumulator adds.
        for dy in (-1, 0, 1):
            for dx in (-1, 0, 1):
                k = (dy + 1) * 3 + (dx + 1)
                off = L + dy * Wp + dx                          # static python int
                rhs_ref[pl.ds(k * CPA, CPA), :] = maskp_ref[0, :, pl.ds(off, Np)]

        coarse = jnp.dot(wf_ref[0], rhs_ref[...],
                         preferred_element_type=jnp.float32)[:T]        # (T, Np) f32
        coarse_ref[0] = coarse

        # sigmoid -> spatial softmax (valid columns only) -> pooled class features.
        # The ones/bias channel of the padded mask is exactly the valid-pixel mask.
        prob = pl.reciprocal(1.0 + jnp.exp(-coarse), approx=True)
        pmax = jnp.max(prob, axis=-1, keepdims=True)
        vmask = maskp_ref[0, pl.ds(C, 1), pl.ds(L, Np)].astype(jnp.float32)      # (1, Np)
        pe = jnp.exp(prob - pmax) * vmask
        weights = pe * pl.reciprocal(jnp.sum(pe, axis=-1, keepdims=True),
                                     approx=True)                        # (T, Np)

        mask_c = maskp_ref[0, :C, pl.ds(L, Np)]                          # (C, Np) bf16 (pad cols = 0)
        class_feats = lax.dot_general(
            weights.astype(jnp.bfloat16), mask_c, (((1,), (1,)), ((), ())),
            preferred_element_type=jnp.float32)                          # (T, C)
        class_embeds = lax.dot_general(
            class_feats, wq_ref[...], (((1,), (1,)), ((), ())),
            preferred_element_type=jnp.float32) + bq_ref[...]            # (T, E)
        sim = lax.dot_general(
            class_embeds, proto_ref[...], (((1,), (1,)), ((), ())),
            preferred_element_type=jnp.float32)                          # (T, Q)
        smax = jnp.max(sim, axis=0, keepdims=True)
        se = jnp.exp(sim - smax)
        attn = se * pl.reciprocal(jnp.sum(se, axis=0, keepdims=True), approx=True)
        anchors_ref[0] = lax.dot_general(
            attn, class_embeds, (((0,), (0,)), ((), ())),
            preferred_element_type=jnp.float32)                          # (Q, E)

    coarse_pad, anchors = pl.pallas_call(
        kernel,
        out_shape=(jax.ShapeDtypeStruct((B, T, Np), jnp.float32),
                   jax.ShapeDtypeStruct((B, Q, E), jnp.float32)),
        grid=(B,),
        in_specs=[
            pl.BlockSpec((1, CPA, NPTOT), lambda b: (b, 0, 0)),
            pl.BlockSpec((1, TPAD, 9 * CPA), lambda b: (b, 0, 0)),
            pl.BlockSpec((E, C), lambda b: (0, 0)),
            pl.BlockSpec((1, E), lambda b: (0, 0)),
            pl.BlockSpec((Q, E), lambda b: (0, 0)),
        ],
        out_specs=(pl.BlockSpec((1, T, Np), lambda b: (b, 0, 0)),
                   pl.BlockSpec((1, Q, E), lambda b: (b, 0, 0))),
        scratch_shapes=[pltpu.VMEM((9 * CPA, Np), jnp.bfloat16)],
        compiler_params=pltpu.CompilerParams(
            dimension_semantics=("parallel",)),
    )(maskp, wf, params["wq"], params["bq"].reshape(1, E), params["proto"])

    # drop the two zero columns per image row (layout plumbing only)
    coarse = coarse_pad.reshape(B, T, H, Wp)[:, :, :, 1:W + 1]
    return coarse, anchors


# ------------------------- pure-JAX reference (ground truth) -----------------
def reference(mask_features, text_features, params):
    B, C, H, W = mask_features.shape
    text = text_features[:, :-1]
    _, T, P, Cemb = text.shape
    hp = lax.Precision.HIGHEST
    fa = (jnp.einsum("ec,bchw->behw", params["wfp"], mask_features, precision=hp)
          + params["bfp"][None, :, None, None])
    coarse = jnp.einsum("bchw,btpc->btphw", fa, text, precision=hp)
    coarse = coarse.reshape(B * T, P, H, W)
    coarse = lax.conv_general_dilated(
        coarse, params["w3"][None], window_strides=(1, 1),
        padding=((1, 1), (1, 1)),
        dimension_numbers=("NCHW", "OIHW", "NCHW"),
        precision=hp) + params["b3"].reshape(1, 1, 1, 1)
    coarse = coarse.reshape(B, T, H, W)
    prob = jax.nn.sigmoid(coarse)
    weights = jax.nn.softmax(prob.reshape(B, T, -1), axis=-1)
    feats_flat = mask_features.reshape(B, C, -1)
    class_feats = jnp.einsum("btn,bcn->btc", weights, feats_flat, precision=hp)
    class_embeds = jnp.einsum("btc,ec->bte", class_feats, params["wq"],
                              precision=hp) + params["bq"]
    sim = jnp.einsum("bte,qe->btq", class_embeds, params["proto"], precision=hp)
    attn = jax.nn.softmax(sim, axis=1)
    anchors = jnp.einsum("btq,bte->bqe", attn, class_embeds, precision=hp)
    return coarse, anchors


if __name__ == "__main__":
    B, C, H, W = 2, 8, 8, 128          # in_channels = 8
    T, P = 4, 4                        # prompt_number = 4, text has T+1 groups
    Cemb, E, Q = 8, 16, 8              # class_embed_dim, transformer_embed_dim, num_queries

    key = jax.random.PRNGKey(0)
    ks = jax.random.split(key, 9)
    params = {
        "wfp": 0.1 * jax.random.normal(ks[0], (Cemb, C), jnp.float32),   # feat_proj weight
        "bfp": 0.1 * jax.random.normal(ks[1], (Cemb,), jnp.float32),     # feat_proj bias
        "w3": 0.1 * jax.random.normal(ks[2], (P, 3, 3), jnp.float32),    # coarse_embed weight
        "b3": 0.1 * jax.random.normal(ks[3], (1,), jnp.float32),         # coarse_embed bias
        "wq": 0.1 * jax.random.normal(ks[4], (E, C), jnp.float32),       # query_proj weight
        "bq": 0.1 * jax.random.normal(ks[5], (E,), jnp.float32),         # query_proj bias
        "proto": jax.random.normal(ks[6], (Q, E), jnp.float32),          # query_proto
    }
    mask_features = jax.random.normal(ks[7], (B, C, H, W), jnp.float32)
    text_features = jax.random.normal(ks[8], (B, T + 1, P, Cemb), jnp.float32)

    fwd = jax.jit(prior_generator_forward)
    coarse, anchors = fwd(mask_features, text_features, params)
    jax.block_until_ready((coarse, anchors))

    ref_coarse, ref_anchors = reference(mask_features, text_features, params)
    assert coarse.shape == (B, T, H, W) and anchors.shape == (B, Q, E)
    # kernel uses bf16 MXU operands + approx reciprocals, reference uses
    # Precision.HIGHEST f32 -> compare at 1e-2.
    assert jnp.allclose(coarse, ref_coarse, atol=1e-2, rtol=1e-2)
    assert jnp.allclose(anchors, ref_anchors, atol=1e-2, rtol=1e-2)
    print("KERNEL_OK")
</pallas_src>

<mosaic_0001>
module attributes {stable_mosaic.version = 11 : i64} {
  func.func @kernel(%arg0: i32, %arg1: memref<1x16x1536xbf16, #tpu.memory_space<vmem>>, %arg2: memref<1x8x144xbf16, #tpu.memory_space<vmem>>, %arg3: memref<16x8xf32, #tpu.memory_space<vmem>>, %arg4: memref<1x16xf32, #tpu.memory_space<vmem>>, %arg5: memref<8x16xf32, #tpu.memory_space<vmem>>, %arg6: memref<1x4x1040xf32, #tpu.memory_space<vmem>>, %arg7: memref<1x8x16xf32, #tpu.memory_space<vmem>>, %arg8: memref<144x1040xbf16, #tpu.memory_space<vmem>>) attributes {dimension_semantics = [#tpu.dimension_semantics<parallel>], iteration_bounds = array<i64: 2>, scalar_prefetch = 0 : i64, scratch_operands = 1 : i64, tpu.core_type = #tpu.core_type<tc>, window_params = [{transform_indices = @transform_0, window_bounds = array<i64: 1, 16, 1536>}, {transform_indices = @transform_1, window_bounds = array<i64: 1, 8, 144>}, {pipeline_mode = #tpu.pipeline_mode<synchronous>, transform_indices = @transform_2, window_bounds = array<i64: 16, 8>}, {pipeline_mode = #tpu.pipeline_mode<synchronous>, transform_indices = @transform_3, window_bounds = array<i64: 1, 16>}, {pipeline_mode = #tpu.pipeline_mode<synchronous>, transform_indices = @transform_4, window_bounds = array<i64: 8, 16>}, {transform_indices = @transform_5, window_bounds = array<i64: 1, 4, 1040>}, {transform_indices = @transform_6, window_bounds = array<i64: 1, 8, 16>}]} {
    %c0 = arith.constant 0 : index
    %c0_0 = arith.constant 0 : index
    %c125 = arith.constant 125 : index
    %0 = vector.load %arg1[%c0, %c0_0, %c125] : memref<1x16x1536xbf16, #tpu.memory_space<vmem>>, vector<1x16x1040xbf16>
    %1 = vector.shape_cast %0 : vector<1x16x1040xbf16> to vector<16x1040xbf16>
    %c0_1 = arith.constant 0 : index
    %c0_2 = arith.constant 0 : index
    %2 = vector.load %arg8[%c0_1, %c0_2] : memref<144x1040xbf16, #tpu.memory_space<vmem>>, vector<16x1040xbf16>
    tpu.vector_store %arg8[%c0_1, %c0_2], %1 {strides = array<i32>} : memref<144x1040xbf16, #tpu.memory_space<vmem>>, vector<16x1040xbf16>,
    %c0_3 = arith.constant 0 : index
    %c0_4 = arith.constant 0 : index
    %c126 = arith.constant 126 : index
    %3 = vector.load %arg1[%c0_3, %c0_4, %c126] : memref<1x16x1536xbf16, #tpu.memory_space<vmem>>, vector<1x16x1040xbf16>
    %4 = vector.shape_cast %3 : vector<1x16x1040xbf16> to vector<16x1040xbf16>
    %c16 = arith.constant 16 : index
    %c0_5 = arith.constant 0 : index
    %5 = vector.load %arg8[%c16, %c0_5] : memref<144x1040xbf16, #tpu.memory_space<vmem>>, vector<16x1040xbf16>
    tpu.vector_store %arg8[%c16, %c0_5], %4 {strides = array<i32>} : memref<144x1040xbf16, #tpu.memory_space<vmem>>, vector<16x1040xbf16>,
    %c0_6 = arith.constant 0 : index
    %c0_7 = arith.constant 0 : index
    %c127 = arith.constant 127 : index
    %6 = vector.load %arg1[%c0_6, %c0_7, %c127] : memref<1x16x1536xbf16, #tpu.memory_space<vmem>>, vector<1x16x1040xbf16>
    %7 = vector.shape_cast %6 : vector<1x16x1040xbf16> to vector<16x1040xbf16>
    %c32 = arith.constant 32 : index
    %c0_8 = arith.constant 0 : index
    %8 = vector.load %arg8[%c32, %c0_8] : memref<144x1040xbf16, #tpu.memory_space<vmem>>, vector<16x1040xbf16>
    tpu.vector_store %arg8[%c32, %c0_8], %7 {strides = array<i32>} : memref<144x1040xbf16, #tpu.memory_space<vmem>>, vector<16x1040xbf16>,
    %c0_9 = arith.constant 0 : index
    %c0_10 = arith.constant 0 : index
    %c255 = arith.constant 255 : index
    %9 = vector.load %arg1[%c0_9, %c0_10, %c255] : memref<1x16x1536xbf16, #tpu.memory_space<vmem>>, vector<1x16x1040xbf16>
    %10 = vector.shape_cast %9 : vector<1x16x1040xbf16> to vector<16x1040xbf16>
    %c48 = arith.constant 48 : index
    %c0_11 = arith.constant 0 : index
    %11 = vector.load %arg8[%c48, %c0_11] : memref<144x1040xbf16, #tpu.memory_space<vmem>>, vector<16x1040xbf16>
    tpu.vector_store %arg8[%c48, %c0_11], %10 {strides = array<i32>} : memref<144x1040xbf16, #tpu.memory_space<vmem>>, vector<16x1040xbf16>,
    %c0_12 = arith.constant 0 : index
    %c0_13 = arith.constant 0 : index
    %c256 = arith.constant 256 : index
    %12 = vector.load %arg1[%c0_12, %c0_13, %c256] : memref<1x16x1536xbf16, #tpu.memory_space<vmem>>, vector<1x16x1040xbf16>
    %13 = vector.shape_cast %12 : vector<1x16x1040xbf16> to vector<16x1040xbf16>
    %c64 = arith.constant 64 : index
    %c0_14 = arith.constant 0 : index
    %14 = vector.load %arg8[%c64, %c0_14] : memref<144x1040xbf16, #tpu.memory_space<vmem>>, vector<16x1040xbf16>
    tpu.vector_store %arg8[%c64, %c0_14], %13 {strides = array<i32>} : memref<144x1040xbf16, #tpu.memory_space<vmem>>, vector<16x1040xbf16>,
    %c0_15 = arith.constant 0 : index
    %c0_16 = arith.constant 0 : index
    %c257 = arith.constant 257 : index
    %15 = vector.load %arg1[%c0_15, %c0_16, %c257] : memref<1x16x1536xbf16, #tpu.memory_space<vmem>>, vector<1x16x1040xbf16>
    %16 = vector.shape_cast %15 : vector<1x16x1040xbf16> to vector<16x1040xbf16>
    %c80 = arith.constant 80 : index
    %c0_17 = arith.constant 0 : index
    %17 = vector.load %arg8[%c80, %c0_17] : memref<144x1040xbf16, #tpu.memory_space<vmem>>, vector<16x1040xbf16>
    tpu.vector_store %arg8[%c80, %c0_17], %16 {strides = array<i32>} : memref<144x1040xbf16, #tpu.memory_space<vmem>>, vector<16x1040xbf16>,
    %c0_18 = arith.constant 0 : index
    %c0_19 = arith.constant 0 : index
    %c385 = arith.constant 385 : index
    %18 = vector.load %arg1[%c0_18, %c0_19, %c385] : memref<1x16x1536xbf16, #tpu.memory_space<vmem>>, vector<1x16x1040xbf16>
    %19 = vector.shape_cast %18 : vector<1x16x1040xbf16> to vector<16x1040xbf16>
    %c96 = arith.constant 96 : index
    %c0_20 = arith.constant 0 : index
    %20 = vector.load %arg8[%c96, %c0_20] : memref<144x1040xbf16, #tpu.memory_space<vmem>>, vector<16x1040xbf16>
    tpu.vector_store %arg8[%c96, %c0_20], %19 {strides = array<i32>} : memref<144x1040xbf16, #tpu.memory_space<vmem>>, vector<16x1040xbf16>,
    %c0_21 = arith.constant 0 : index
    %c0_22 = arith.constant 0 : index
    %c386 = arith.constant 386 : index
    %21 = vector.load %arg1[%c0_21, %c0_22, %c386] : memref<1x16x1536xbf16, #tpu.memory_space<vmem>>, vector<1x16x1040xbf16>
    %22 = vector.shape_cast %21 : vector<1x16x1040xbf16> to vector<16x1040xbf16>
    %c112 = arith.constant 112 : index
    %c0_23 = arith.constant 0 : index
    %23 = vector.load %arg8[%c112, %c0_23] : memref<144x1040xbf16, #tpu.memory_space<vmem>>, vector<16x1040xbf16>
    tpu.vector_store %arg8[%c112, %c0_23], %22 {strides = array<i32>} : memref<144x1040xbf16, #tpu.memory_space<vmem>>, vector<16x1040xbf16>,
    %c0_24 = arith.constant 0 : index
    %c0_25 = arith.constant 0 : index
    %c387 = arith.constant 387 : index
    %24 = vector.load %arg1[%c0_24, %c0_25, %c387] : memref<1x16x1536xbf16, #tpu.memory_space<vmem>>, vector<1x16x1040xbf16>
    %25 = vector.shape_cast %24 : vector<1x16x1040xbf16> to vector<16x1040xbf16>
    %c128 = arith.constant 128 : index
    %c0_26 = arith.constant 0 : index
    %26 = vector.load %arg8[%c128, %c0_26] : memref<144x1040xbf16, #tpu.memory_space<vmem>>, vector<16x1040xbf16>
    tpu.vector_store %arg8[%c128, %c0_26], %25 {strides = array<i32>} : memref<144x1040xbf16, #tpu.memory_space<vmem>>, vector<16x1040xbf16>,
    %c0_27 = arith.constant 0 : index
    %c0_28 = arith.constant 0 : index
    %c0_29 = arith.constant 0 : index
    %27 = vector.load %arg2[%c0_27, %c0_28, %c0_29] : memref<1x8x144xbf16, #tpu.memory_space<vmem>>, vector<1x8x144xbf16>
    %28 = vector.shape_cast %27 : vector<1x8x144xbf16> to vector<8x144xbf16>
    %c0_30 = arith.constant 0 : index
    %c0_31 = arith.constant 0 : index
    %29 = vector.load %arg8[%c0_30, %c0_31] : memref<144x1040xbf16, #tpu.memory_space<vmem>>, vector<144x1040xbf16>
    %cst = arith.constant dense<0.000000e+00> : vector<8x1040xf32>
    %30 = tpu.matmul %28, %29, %cst {dimension_numbers = #tpu.dot_dimension_numbers<[1], [0], [0], [1], [0, 0, 1, 1], [], []>} : vector<8x144xbf16>, vector<144x1040xbf16>, vector<8x1040xf32> -> vector<8x1040xf32>
    %31 = vector.extract_strided_slice %30 {offsets = [0, 0], sizes = [4, 1040], strides = [1, 1]} : vector<8x1040xf32> to vector<4x1040xf32>
    %c0_32 = arith.constant 0 : index
    %c0_33 = arith.constant 0 : index
    %c0_34 = arith.constant 0 : index
    %32 = vector.load %arg6[%c0_32, %c0_33, %c0_34] : memref<1x4x1040xf32, #tpu.memory_space<vmem>>, vector<1x4x1040xf32>
    %33 = vector.shape_cast %32 : vector<1x4x1040xf32> to vector<4x1040xf32>
    %34 = vector.shape_cast %31 : vector<4x1040xf32> to vector<1x4x1040xf32>
    tpu.vector_store %arg6[%c0_32, %c0_33, %c0_34], %34 {strides = array<i32>} : memref<1x4x1040xf32, #tpu.memory_space<vmem>>, vector<1x4x1040xf32>,
    %cst_35 = arith.constant 0.000000e+00 : f32
    %35 = vector.broadcast %cst_35 : f32 to vector<4x1040xf32>
    %36 = arith.subf %35, %31 : vector<4x1040xf32>
    %37 = math.exp %36 : vector<4x1040xf32>
    %cst_36 = arith.constant 1.000000e+00 : f32
    %38 = vector.broadcast %cst_36 : f32 to vector<4x1040xf32>
    %39 = arith.addf %38, %37 : vector<4x1040xf32>
    %40 = tpu.reciprocal %39 {approx = true} : vector<4x1040xf32> -> vector<4x1040xf32>
    %cst_37 = arith.constant dense<0xFF800000> : vector<4xf32>
    %41 = vector.multi_reduction <maximumf>, %40, %cst_37 [1] : vector<4x1040xf32> to vector<4xf32>
    %42 = vector.shape_cast %41 : vector<4xf32> to vector<4x1xf32>
    %c0_38 = arith.constant 0 : index
    %c8 = arith.constant 8 : index
    %c256_39 = arith.constant 256 : index
    %43 = vector.load %arg1[%c0_38, %c8, %c256_39] : memref<1x16x1536xbf16, #tpu.memory_space<vmem>>, vector<1x1x1040xbf16>
    %44 = vector.shape_cast %43 : vector<1x1x1040xbf16> to vector<1x1040xbf16>
    %45 = arith.extf %44 : vector<1x1040xbf16> to vector<1x1040xf32>
    %46 = vector.broadcast %42 : vector<4x1xf32> to vector<4x1040xf32>
    %47 = arith.subf %40, %46 : vector<4x1040xf32>
    %48 = math.exp %47 : vector<4x1040xf32>
    %49 = vector.broadcast %45 : vector<1x1040xf32> to vector<4x1040xf32>
    %50 = arith.mulf %48, %49 : vector<4x1040xf32>
    %cst_40 = arith.constant dense<0.000000e+00> : vector<4xf32>
    %51 = vector.multi_reduction <add>, %50, %cst_40 [1] : vector<4x1040xf32> to vector<4xf32>
    %52 = vector.shape_cast %51 : vector<4xf32> to vector<4x1xf32>
    %53 = tpu.reciprocal %52 {approx = true} : vector<4x1xf32> -> vector<4x1xf32>
    %54 = vector.broadcast %53 : vector<4x1xf32> to vector<4x1040xf32>
    %55 = arith.mulf %50, %54 : vector<4x1040xf32>
    %c0_41 = arith.constant 0 : index
    %c0_42 = arith.constant 0 : index
    %c256_43 = arith.constant 256 : index
    %56 = vector.load %arg1[%c0_41, %c0_42, %c256_43] : memref<1x16x1536xbf16, #tpu.memory_space<vmem>>, vector<1x8x1040xbf16>
    %57 = vector.shape_cast %56 : vector<1x8x1040xbf16> to vector<8x1040xbf16>
    %58 = arith.truncf %55 : vector<4x1040xf32> to vector<4x1040xbf16>
    %cst_44 = arith.constant dense<0.000000e+00> : vector<4x8xf32>
    %59 = tpu.matmul %58, %57, %cst_44 {dimension_numbers = #tpu.dot_dimension_numbers<[1], [1], [0], [0], [0, 0, 1, 0], [], []>} : vector<4x1040xbf16>, vector<8x1040xbf16>, vector<4x8xf32> -> vector<4x8xf32>
    %c0_45 = arith.constant 0 : index
    %c0_46 = arith.constant 0 : index
    %60 = vector.load %arg3[%c0_45, %c0_46] : memref<16x8xf32, #tpu.memory_space<vmem>>, vector<16x8xf32>
    %cst_47 = arith.constant dense<0.000000e+00> : vector<4x16xf32>
    %61 = tpu.matmul %59, %60, %cst_47 {dimension_numbers = #tpu.dot_dimension_numbers<[1], [1], [0], [0], [0, 0, 1, 0], [], []>} : vector<4x8xf32>, vector<16x8xf32>, vector<4x16xf32> -> vector<4x16xf32>
    %c0_48 = arith.constant 0 : index
    %c0_49 = arith.constant 0 : index
    %62 = vector.load %arg4[%c0_48, %c0_49] : memref<1x16xf32, #tpu.memory_space<vmem>>, vector<1x16xf32>
    %63 = vector.broadcast %62 : vector<1x16xf32> to vector<4x16xf32>
    %64 = arith.addf %61, %63 : vector<4x16xf32>
    %c0_50 = arith.constant 0 : index
    %c0_51 = arith.constant 0 : index
    %65 = vector.load %arg5[%c0_50, %c0_51] : memref<8x16xf32, #tpu.memory_space<vmem>>, vector<8x16xf32>
    %cst_52 = arith.constant dense<0.000000e+00> : vector<4x8xf32>
    %66 = tpu.matmul %64, %65, %cst_52 {dimension_numbers = #tpu.dot_dimension_numbers<[1], [1], [0], [0], [0, 0, 1, 0], [], []>} : vector<4x16xf32>, vector<8x16xf32>, vector<4x8xf32> -> vector<4x8xf32>
    %cst_53 = arith.constant dense<0xFF800000> : vector<8xf32>
    %67 = vector.multi_reduction <maximumf>, %66, %cst_53 [0] : vector<4x8xf32> to vector<8xf32>
    %68 = vector.shape_cast %67 : vector<8xf32> to vector<1x8xf32>
    %69 = vector.broadcast %68 : vector<1x8xf32> to vector<4x8xf32>
    %70 = arith.subf %66, %69 : vector<4x8xf32>
    %71 = math.exp %70 : vector<4x8xf32>
    %cst_54 = arith.constant dense<0.000000e+00> : vector<8xf32>
    %72 = vector.multi_reduction <add>, %71, %cst_54 [0] : vector<4x8xf32> to vector<8xf32>
    %73 = vector.shape_cast %72 : vector<8xf32> to vector<1x8xf32>
    %74 = tpu.reciprocal %73 {approx = true} : vector<1x8xf32> -> vector<1x8xf32>
    %75 = vector.broadcast %74 : vector<1x8xf32> to vector<4x8xf32>
    %76 = arith.mulf %71, %75 : vector<4x8xf32>
    %cst_55 = arith.constant dense<0.000000e+00> : vector<8x16xf32>
    %77 = tpu.matmul %76, %64, %cst_55 {dimension_numbers = #tpu.dot_dimension_numbers<[0], [0], [1], [1], [0, 1, 1, 1], [], []>} : vector<4x8xf32>, vector<4x16xf32>, vector<8x16xf32> -> vector<8x16xf32>
    %c0_56 = arith.constant 0 : index
    %c0_57 = arith.constant 0 : index
    %c0_58 = arith.constant 0 : index
    %78 = vector.load %arg7[%c0_56, %c0_57, %c0_58] : memref<1x8x16xf32, #tpu.memory_space<vmem>>, vector<1x8x16xf32>
    %79 = vector.shape_cast %78 : vector<1x8x16xf32> to vector<8x16xf32>
    %80 = vector.shape_cast %77 : vector<8x16xf32> to vector<1x8x16xf32>
    tpu.vector_store %arg7[%c0_56, %c0_57, %c0_58], %80 {strides = array<i32>} : memref<1x8x16xf32, #tpu.memory_space<vmem>>, vector<1x8x16xf32>,
    return
  }
  func.func @transform_0(%arg0: i32) -> (i32, i32, i32) {
    %c0_i32 = arith.constant 0 : i32
    %c0_i32_0 = arith.constant 0 : i32
    %c0_i32_1 = arith.constant 0 : i32
    return %arg0, %c0_i32, %c0_i32_0 : i32, i32, i32
  }
  func.func @transform_1(%arg0: i32) -> (i32, i32, i32) {
    %c0_i32 = arith.constant 0 : i32
    %c0_i32_0 = arith.constant 0 : i32
    %c0_i32_1 = arith.constant 0 : i32
    return %arg0, %c0_i32, %c0_i32_0 : i32, i32, i32
  }
  func.func @transform_2(%arg0: i32) -> (i32, i32) {
    %c0_i32 = arith.constant 0 : i32
    %c0_i32_0 = arith.constant 0 : i32
    %c0_i32_1 = arith.constant 0 : i32
    return %c0_i32, %c0_i32_0 : i32, i32
  }
  func.func @transform_3(%arg0: i32) -> (i32, i32) {
    %c0_i32 = arith.constant 0 : i32
    %c0_i32_0 = arith.constant 0 : i32
    %c0_i32_1 = arith.constant 0 : i32
    return %c0_i32, %c0_i32_0 : i32, i32
  }
  func.func @transform_4(%arg0: i32) -> (i32, i32) {
    %c0_i32 = arith.constant 0 : i32
    %c0_i32_0 = arith.constant 0 : i32
    %c0_i32_1 = arith.constant 0 : i32
    return %c0_i32, %c0_i32_0 : i32, i32
  }
  func.func @transform_5(%arg0: i32) -> (i32, i32, i32) {
    %c0_i32 = arith.constant 0 : i32
    %c0_i32_0 = arith.constant 0 : i32
    %c0_i32_1 = arith.constant 0 : i32
    return %arg0, %c0_i32, %c0_i32_0 : i32, i32, i32
  }
  func.func @transform_6(%arg0: i32) -> (i32, i32, i32) {
    %c0_i32 = arith.constant 0 : i32
    %c0_i32_0 = arith.constant 0 : i32
    %c0_i32_1 = arith.constant 0 : i32
    return %arg0, %c0_i32, %c0_i32_0 : i32, i32, i32
  }
}

</mosaic_0001>

<bundles_post_ra>
// kernel: prior_generator_forward.1
= control target key start
LH: loop header
LB: loop body
LE: loop exit
PB: predicated region body
PF: predicated region fallthrough
CT: control target
= control target key end

     0   :  { %12 = vsyncpa [#allocation4], 0  ;;  %s3921_s0 = inlined_call_operand.vmem [shape: bf16[2,16,1536], index: 0, kind: input, shape index: {}]   ;;  %s3922_s1 = inlined_call_operand.vmem [shape: bf16[2,8,144], index: 1, kind: input, shape index: {}]   ;;  %s3923_s2 = inlined_call_operand.vmem [shape: f32[16,8], index: 2, kind: input, shape index: {}]   ;;  %s3924_s3 = inlined_call_operand.vmem [shape: f32[1,16], index: 3, kind: input, shape index: {}]   ;;  %s3925_s4 = inlined_call_operand.vmem [shape: f32[8,16], index: 4, kind: input, shape index: {}]   ;;  %s3926_s5 = inlined_call_operand.vmem [shape: f32[2,4,1040], index: 5, kind: output, shape index: {0}]   ;;  %s3927_s6 = inlined_call_operand.hbm [shape: f32[2,8,16], index: 6, kind: output, shape index: {1}]  }
   0x1   :  { %14 = vsyncpa [#allocation4 + $0x1], 0  ;;  %s3016_s21 = smov 0   ;;  %s3018_s22 = smov 0  }
   0x2   :  { %s3020_s23 = smov 0   ;;  %s3022_s24 = smov 0  }
   0x3 LB: > { %s3037_s25 = sadd.s32 4294967295, %s2973_s24   ;;  %s2365_s26 = sadd.s32 4294967294, %s2973_s24   ;;  %s2973_s24 = sphi %s3022_s24, %s3933_s24   ;;  %s2969_s23 = sphi %s3020_s23, %s3932_s23   ;;  %s2965_s22 = sphi %s3018_s22, %s3931_s22   ;;  %s2961_s21 = sphi %s3016_s21, %s3930_s21  }
   0x4   : > { %s3041_s27 = sadd.s32 1, %s2973_s24   ;;  %s168_s28 = sadd.s32 1, %s2969_s23 }
   0x5   : > { %s165_s29 = ssub.s32 %s2973_s24, %s3041_s27  ;;  %p178_p0 = scmp.ne.s32.totalorder %s2969_s23, %s2965_s22 }
   0x6   : > { %p166_p1 = scmp.eq.s32.totalorder %s165_s29, 0  ;;  %p179_p2 = scmp.eq.s32.totalorder %s3037_s25, 1 }
   0x7   : > { %p184_p3 = scmp.ne.s32.totalorder %s2965_s22, %s2961_s21  ;;  %p185_p4 = scmp.eq.s32.totalorder %s2365_s26, 1 }
   0x8   : > { %s3052_s30 = scalar_select %p166_p1, %s2969_s23, %s168_s28  }
   0x9   : > { %p3054_p5 = por %p179_p2, %p178_p0  ;;  %p3058_p6 = por %p185_p4, %p184_p3 }
   0xa   : > { %p2368_p7 = scmp.ge.s32.totalorder %s2973_s24, 1  ;;  %p228_p8 = scmp.lt.s32.totalorder %s2973_s24, 3 }
   0xc   : > { %p229_p9 = pnand %p2368_p7, %p228_p8 }
   0xd   : > { %p268_p10 = scmp.lt.s32.totalorder (!%p229_p9), %s3037_s25, 1  ;;  %s2975_s14 = smov (!%p229_p9), 126  }
   0xe   : > { %232 = sbr.rel (%p229_p9) target bundleno = 1595 (0x63b), region = 40  ;;  %s2976_s15 = smov (!%p229_p9), 127  }
   0xf   : > { %s2977_s16 = smov (!%p229_p9), 125   ;;  %s2978_s17 = smov (!%p229_p9), 1  }
  0x10   : > { %s2979_s18 = smov (!%p229_p9), 2   ;;  %s2980_s19 = smov (!%p229_p9), 3  }
  0x11   : > { %s265_s26 = sand.u32 (!%p229_p9), 1, %s2965_s22  }
  0x12   : > { %s2369_s28 = sshll.u32 (!%p229_p9), %s265_s26, 3 }
  0x13   : > { %s3066_s9 = scalar_select %p268_p10, %s3037_s25, 1  ;;  %vm712_vm0 = vcmask 1039360   ;;  %vm334_vm1 = vcmask 1043456   ;;  %vm885_vm2 = vcmask 1031168   ;;  %vm972_vm3 = vcmask 1022976  }
  0x14   : > { %vm515_vm4 = vcmask 7168   ;;  %vm426_vm5 = vcmask 15360   ;;  %vm1519_vm6 = vcmask 130048   ;;  %vm336_vm7 = vcmask 23552  }
  0x15   : > { %s2801_s10 = smul.u32 96, %s3066_s9  ;;  %s2719_s20 = sshll.u32 %s3066_s9, 3  ;;  %vm368_vm8 = vcmask 125952   ;;  %vm2109_vm9 = vcmask 64512   ;;  %vm2166_vm10 = vcmask 60416   ;;  %vm2218_vm11 = vcmask 31744  }
  0x16   : > { %s277_s29 = scalar_lea.vmem %s3922_s1, %s2719_s20 }
  0x17   : > { %s3072_s13 = scalar_lea.vmem %s3921_s0, %s2801_s10  ;;  %s2802_s10 = smul.u32 36, %s3066_s9 }
  0x18   : > { %v839_v0 = vld [vmem:[%s3072_s13 + $0x3c] sm:$0xff]  ;;  %v834_v1 = vld [vmem:[%s3072_s13 + $0xc] sm:$0xff]  ;;  %v840_v6 = vld [vmem:[%s3072_s13 + $0x44] sm:$0xff] }
  0x19   : > { %864 = vrot.lane.b32.xlu1 %v839_v0, %s2975_s14  ;;  %854 = vrot.lane.b32.xlu0 %v834_v1, %s2975_s14  ;;  %v3080_v2 = vld [vmem:[%s3072_s13 + $0x8] sm:$0xff]  ;;  %v3083_v3 = vld [vmem:[%s3072_s13 + $0x38] sm:$0xff] }
  0x1a   : > { %768 = vrot.lane.b32.xlu2 %v834_v1, %s2976_s15  ;;  %651 = vst [vmem:[#allocation2 + $0x120] sm:$0xff] %v3080_v2  ;;  %v3087_v4 = vld [vmem:[%s3072_s13 + $0x10] sm:$0xff]  ;;  %v3091_v5 = vld [vmem:[%s3072_s13 + $0x40] sm:$0xff]  ;;  %v3127_v10 = vld [vmem:[%s3072_s13 + $0x18] sm:$0xff] }
  0x1b   : > { %656 = vst [vmem:[#allocation2 + $0x144] sm:$0xff] %v3083_v3  ;;  %v835_v7 = vld [vmem:[%s3072_s13 + $0x14] sm:$0xff]  ;;  %v3101_v8 = vld [vmem:[%s3072_s13 + $0x1c] sm:$0xff]  ;;  %v3108_v9 = vld [vmem:[%s3072_s13 + $0x4c] sm:$0xff] }
  0x1c   : > { %652 = vst [vmem:[#allocation2 + $0x128] sm:$0xff] %v3087_v4  ;;  %v3134_v11 = vld [vmem:[%s3072_s13 + $0x48] sm:$0xff]  ;;  %v558_v13 = vld [vmem:[%s3072_s13 + $0x34] sm:$0xff]  ;;  %v464_v16 = vld [vmem:[%s3072_s13] sm:$0xff] }
  0x1d   : > { %657 = vst [vmem:[#allocation2 + $0x14c] sm:$0xff] %v3091_v5  ;;  %v553_v12 = vld [vmem:[%s3072_s13 + $0x4] sm:$0xff]  ;;  %v3150_v15 = vld [vmem:[%s3072_s13 + $0x54] sm:$0xff] }
  0x1e   : > { %v3143_v14 = vld [vmem:[%s3072_s13 + $0x24] sm:$0xff]  ;;  %v469_v17 = vld [vmem:[%s3072_s13 + $0x30] sm:$0xff] }
  0x1f   : > { %v3173_v22 = vld [vmem:[%s3072_s13 + $0x20] sm:$0xff]  ;;  %v3177_v24 = vld [vmem:[%s3072_s13 + $0x50] sm:$0xff] }
  0x21   : > { %866 = vrot.lane.b32.xlu1 %v840_v6, %s2975_s14  ;;  %856 = vrot.lane.b32.xlu0 %v835_v7, %s2975_s14 }
  0x22   : > { %770 = vrot.lane.b32.xlu2 %v835_v7, %s2976_s15 }
  0x29   : > { %780 = vrot.lane.b32.xlu1 %v840_v6, %s2976_s15  ;;  %778 = vrot.lane.b32.xlu0 %v839_v0, %s2976_s15 }
  0x2a   : > { %858 = vrot.lane.b32.xlu2 %v3101_v8, %s2975_s14 }
  0x31   : > { %868 = vrot.lane.b32.xlu0 %v3108_v9, %s2975_s14  ;;  %681 = vrot.lane.b32.xlu1 %v3080_v2, %s2976_s15 }
  0x32   : > { %683 = vrot.lane.b32.xlu2 %v3087_v4, %s2976_s15 }
  0x39   : > { %691 = vrot.lane.b32.xlu0 %v3083_v3, %s2976_s15  ;;  %693 = vrot.lane.b32.xlu1 %v3091_v5, %s2976_s15 }
  0x3a   : > { %772 = vrot.lane.b32.xlu2 %v3101_v8, %s2976_s15 }
  0x41   : > { %782 = vrot.lane.b32.xlu0 %v3108_v9, %s2976_s15  ;;  %941 = vrot.lane.b32.xlu1 %v834_v1, %s2977_s16 }
  0x42   : > { %943 = vrot.lane.b32.xlu2 %v835_v7, %s2977_s16 }
  0x49   : > { %951 = vrot.lane.b32.xlu0 %v839_v0, %s2977_s16  ;;  %953 = vrot.lane.b32.xlu1 %v840_v6, %s2977_s16 }
  0x4a   : > { %685 = vrot.lane.b32.xlu2 %v3127_v10, %s2976_s15 }
  0x51   : > { %695 = vrot.lane.b32.xlu0 %v3134_v11, %s2976_s15  ;;  %573 = vrot.lane.b32.xlu1 %v553_v12, %s2978_s17  ;;  %v838_v12 = vld [vmem:[%s3072_s13 + $0x2c] sm:$0xf] }
  0x52   : > { %575 = vrot.lane.b32.xlu2 %v834_v1, %s2978_s17 }
  0x59   : > { %583 = vrot.lane.b32.xlu0 %v558_v13, %s2978_s17  ;;  %585 = vrot.lane.b32.xlu1 %v839_v0, %s2978_s17 }
  0x5a   : > { %860 = vrot.lane.b32.xlu2 %v3143_v14, %s2975_s14 }
  0x61   : > { %870 = vrot.lane.b32.xlu0 %v3150_v15, %s2975_s14  ;;  %484 = vrot.lane.b32.xlu1 %v464_v16, %s2978_s17 }
  0x62   : > { %486 = vrot.lane.b32.xlu2 %v3080_v2, %s2978_s17 }
  0x69   : > { %494 = vrot.lane.b32.xlu0 %v469_v17, %s2978_s17  ;;  %496 = vrot.lane.b32.xlu1 %v3083_v3, %s2978_s17 }
  0x6a   : > { %774 = vrot.lane.b32.xlu2 %v3143_v14, %s2976_s15 }
  0x71   : > { %784 = vrot.lane.b32.xlu0 %v3150_v15, %s2976_s15  ;;  %577 = vrot.lane.b32.xlu1 %v835_v7, %s2978_s17 }
  0x72   : > { %587 = vrot.lane.b32.xlu2 %v840_v6, %s2978_s17 }
  0x74   : > { %v769_v18 = vpop.permute.xlu2 %768 }
  0x75   : > { %v788_v19 = vrot.slane %v769_v18, 4 }
  0x79   : > { %397 = vrot.lane.b32.xlu1 %v3080_v2, %s2979_s18  ;;  %395 = vrot.lane.b32.xlu0 %v464_v16, %s2979_s18 }
  0x7a   : > { %405 = vrot.lane.b32.xlu2 %v469_v17, %s2979_s18 }
  0x7c   : > { %v771_v20 = vpop.permute.xlu2 %770 }
  0x7d   : > { %v789_v21 = vrot.slane %v771_v20, 4 }
  0x7f   : > { %v798_v23 = vsel %vm334_vm1, %v788_v19, %v789_v21 }
  0x80   : > { %v799_v25 = vsel %vm712_vm0, %v769_v18, %v798_v23 }
  0x81   : > { %824 = vst [vmem:[#allocation2 + $0x1b0] sm:$0xff] %v799_v25  ;;  %687 = vrot.lane.b32.xlu1 %v3173_v22, %s2976_s15  ;;  %407 = vrot.lane.b32.xlu0 %v3083_v3, %s2979_s18 }
  0x82   : > { %697 = vrot.lane.b32.xlu2 %v3177_v24, %s2976_s15 }
  0x84   : > { %v3186_v26 = vpop.permute.xlu2 %858 }
  0x85   : > { %v876_v30 = vrot.slane %v3186_v26, 4 }
  0x88   : > { %v2774_v6 = vld [vmem:[#allocation2 + $0x1b4] sm:$0xf] }
  0x89   : > { %498 = vrot.lane.b32.xlu1 %v3091_v5, %s2978_s17  ;;  %488 = vrot.lane.b32.xlu0 %v3087_v4, %s2978_s17 }
  0x8a   : > { %304 = vrot.lane.b32.xlu2 %v464_v16, %s2980_s19 }
  0x8b   : > { %v865_v27 = vpop.permute.xlu1 %864  ;;  %v855_v28 = vpop.permute.xlu0 %854 }
  0x8c   : > { %v3193_v29 = vpop.permute.xlu2 %683  ;;  %v879_v33 = vrot.slane %v865_v27, 4  ;;  %v874_v34 = vrot.slane %v855_v28, 4 }
  0x8d   : > { %v702_v60 = vrot.slane %v3193_v29, 4 }
  0x91   : > { %314 = vrot.lane.b32.xlu1 %v469_v17, %s2980_s19  ;;  %306 = vrot.lane.b32.xlu0 %v3080_v2, %s2980_s19 }
  0x92   : > { %316 = vrot.lane.b32.xlu2 %v3083_v3, %s2980_s19  ;;  %v2592_v3 = vld [vmem:[#allocation2 + $0x1b0] sm:$0xf] }
  0x93   : > { %v867_v31 = vpop.permute.xlu1 %866  ;;  %v857_v32 = vpop.permute.xlu0 %856 }
  0x94   : > { %v880_v35 = vrot.slane %v867_v31, 4  ;;  %v875_v36 = vrot.slane %v857_v32, 4  ;;  %v3201_v37 = vpop.permute.xlu2 %772 }
  0x95   : > { %v790_v38 = vrot.slane %v3201_v37, 4 }
  0x96   : > { %v893_v39 = vsel %vm334_vm1, %v879_v33, %v880_v35  ;;  %v884_v40 = vsel %vm334_vm1, %v874_v34, %v875_v36  ;;  %v887_v41 = vsel %vm334_vm1, %v875_v36, %v876_v30 }
  0x97   : > { %v894_v42 = vsel %vm885_vm2, %v865_v27, %v893_v39  ;;  %v886_v43 = vsel %vm885_vm2, %v855_v28, %v884_v40  ;;  %v888_v44 = vsel %vm885_vm2, %v857_v32, %v887_v41  ;;  %v800_v45 = vsel %vm334_vm1, %v789_v21, %v790_v38 }
  0x98   : > { %916 = vst [vmem:[#allocation2 + $0x21c] sm:$0xff] %v894_v42  ;;  %v801_v46 = vsel %vm712_vm0, %v771_v20, %v800_v45  ;;  %v757_v42 = vld [vmem:[%s3072_s13 + $0x5c] sm:$0xf] }
  0x99   : > { %911 = vst [vmem:[#allocation2 + $0x1f8] sm:$0xff] %v886_v43  ;;  %955 = vrot.lane.b32.xlu1 %v3108_v9, %s2977_s16  ;;  %945 = vrot.lane.b32.xlu0 %v3101_v8, %s2977_s16  ;;  %v752_v43 = vld [vmem:[%s3072_s13 + $0x2c] sm:$0xf] }
  0x9a   : > { %912 = vst [vmem:[#allocation2 + $0x200] sm:$0xff] %v888_v44  ;;  %399 = vrot.lane.b32.xlu2 %v3087_v4, %s2979_s18 }
  0x9b   : > { %825 = vst [vmem:[#allocation2 + $0x1b8] sm:$0xff] %v801_v46  ;;  %v3222_v47 = vpop.permute.xlu1 %780  ;;  %v779_v48 = vpop.permute.xlu0 %778 }
  0x9c   : > { %v794_v49 = vrot.slane %v3222_v47, 4  ;;  %v793_v50 = vrot.slane %v779_v48, 4  ;;  %v3225_v51 = vpop.permute.xlu2 %943 }
  0x9e   : > { %v806_v52 = vsel %vm334_vm1, %v793_v50, %v794_v49 }
  0x9f   : > { %v807_v53 = vsel %vm712_vm0, %v779_v48, %v806_v52  ;;  %v2787_v54 = vld [vmem:[#allocation2 + $0x218] sm:$0xf0]  ;;  %v2630_v55 = vld [vmem:[#allocation2 + $0x21c] sm:$0xf0] }
  0xa0   : > { %829 = vst [vmem:[#allocation2 + $0x1d4] sm:$0xff] %v807_v53  ;;  %v2628_v56 = vld [vmem:[#allocation2 + $0x1f8] sm:$0xf]  ;;  %v2783_v57 = vld [vmem:[#allocation2 + $0x1fc] sm:$0xf] }
  0xa1   : > { %579 = vrot.lane.b32.xlu1 %v3101_v8, %s2978_s17  ;;  %409 = vrot.lane.b32.xlu0 %v3091_v5, %s2979_s18  ;;  %v2629_v58 = vor.u32 %v2787_v54, %v2628_v56  ;;  %v2633_v59 = vor.u32 %v2783_v57, %v2630_v55  ;;  %v2520_v48 = vld [vmem:[#allocation2 + $0x120] sm:$0xf]  ;;  %v2760_v55 = vld [vmem:[#allocation2 + $0x140] sm:$0xf0] }
  0xa2   : > { %589 = vrot.lane.b32.xlu2 %v3108_v9, %s2978_s17  ;;  %v843_v9 = vld [vmem:[%s3072_s13 + $0x5c] sm:$0xf] }
  0xa3   : > { %1523 = vmatpush.bf16.msra.mxu0 %v2629_v58  ;;  %1549 = vmatpush.bf16.msra.mxu2 %v2633_v59  ;;  %v3238_v61 = vpop.permute.xlu0 %868  ;;  %v682_v62 = vpop.permute.xlu1 %681  ;;  %v2756_v59 = vld [vmem:[#allocation2 + $0x124] sm:$0xf] }
  0xa4   : > { %v881_v63 = vrot.slane %v3238_v61, 4  ;;  %v3241_v0 = vpop.permute.xlu2 %685  ;;  %v701_v1 = vrot.slane %v682_v62, 4 }
  0xa5   : > { %v703_v2 = vrot.slane %v3241_v0, 4 }
  0xa6   : > { %v895_v7 = vsel %vm334_vm1, %v880_v35, %v881_v63  ;;  %v711_v8 = vsel %vm334_vm1, %v701_v1, %v702_v60 }
  0xa7   : > { %v896_v13 = vsel %vm885_vm2, %v867_v31, %v895_v7  ;;  %v714_v16 = vsel %vm334_vm1, %v702_v60, %v703_v2  ;;  %v713_v17 = vsel %vm712_vm0, %v682_v62, %v711_v8  ;;  %v2778_v18 = vld [vmem:[#allocation2 + $0x1d0] sm:$0xf0]  ;;  %v2594_v19 = vld [vmem:[#allocation2 + $0x1d4] sm:$0xf0]  ;;  %v2522_v60 = vld [vmem:[#allocation2 + $0x144] sm:$0xf0] }
  0xa8   : > { %917 = vst [vmem:[#allocation2 + $0x224] sm:$0xff] %v896_v13  ;;  %v715_v20 = vsel %vm712_vm0, %v3193_v29, %v714_v16  ;;  %v2593_v21 = vor.u32 %v2778_v18, %v2592_v3  ;;  %v2597_v23 = vor.u32 %v2774_v6, %v2594_v19  ;;  %v2525_v62 = vor.u32 %v2756_v59, %v2522_v60  ;;  %v665_v8 = vld [vmem:[%s3072_s13 + $0x28] sm:$0xf] }
  0xa9   : > { %739 = vst [vmem:[#allocation2 + $0x170] sm:$0xff] %v715_v20  ;;  %872 = vrot.lane.b32.xlu1 %v843_v9, %s2975_s14  ;;  %862 = vrot.lane.b32.xlu0 %v838_v12, %s2975_s14  ;;  %v670_v12 = vld [vmem:[%s3072_s13 + $0x58] sm:$0xf]  ;;  %s3795_s14 = scalar_lea.vmem %s3926_s5, %s2802_s10 }
  0xaa   : > { %738 = vst [vmem:[#allocation2 + $0x168] sm:$0xff] %v713_v17  ;;  %308 = vrot.lane.b32.xlu2 %v3087_v4, %s2980_s19  ;;  %1524 = vmatpush.bf16.msra.mxu0 %v2593_v21  ;;  %v962_v4 = vrot.slane %v3225_v51, 4 }
  0xab   : > { %1550 = vmatpush.bf16.msra.mxu2 %v2597_v23  ;;  %v692_v25 = vpop.permute.xlu0 %691  ;;  %v3261_v27 = vpop.permute.xlu1 %693 }
  0xac   : > { %v706_v28 = vrot.slane %v692_v25, 4  ;;  %v707_v31 = vrot.slane %v3261_v27, 4  ;;  %v3264_v29 = vpop.permute.xlu2 %575 }
  0xad   : > { %v594_v13 = vrot.slane %v3264_v29, 4 }
  0xae   : > { %v720_v32 = vsel %vm334_vm1, %v706_v28, %v707_v31 }
  0xaf   : > { %v721_v33 = vsel %vm712_vm0, %v692_v25, %v720_v32  ;;  %v2788_v32 = vld [vmem:[#allocation2 + $0x220] sm:$0xf0] }
  0xb0   : > { %743 = vst [vmem:[#allocation2 + $0x18c] sm:$0xff] %v721_v33 }
  0xb1   : > { %490 = vrot.lane.b32.xlu1 %v3127_v10, %s2978_s17  ;;  %318 = vrot.lane.b32.xlu0 %v3091_v5, %s2980_s19  ;;  %v2556_v45 = vld [vmem:[#allocation2 + $0x168] sm:$0xf]  ;;  %v2765_v46 = vld [vmem:[#allocation2 + $0x16c] sm:$0xf] }
  0xb2   : > { %500 = vrot.lane.b32.xlu2 %v3134_v11, %s2978_s17 }
  0xb3   : > { %v3277_v34 = vpop.permute.xlu0 %782  ;;  %v942_v35 = vpop.permute.xlu1 %941 }
  0xb4   : > { %v795_v36 = vrot.slane %v3277_v34, 4  ;;  %v961_v39 = vrot.slane %v942_v35, 4  ;;  %v3280_v40 = vpop.permute.xlu2 %860 }
  0xb5   : > { %v877_v41 = vrot.slane %v3280_v40, 4 }
  0xb6   : > { %v808_v5 = vsel %vm334_vm1, %v794_v49, %v795_v36  ;;  %v971_v44 = vsel %vm334_vm1, %v961_v39, %v962_v4 }
  0xb7   : > { %v809_v50 = vsel %vm712_vm0, %v3222_v47, %v808_v5  ;;  %v973_v52 = vsel %vm972_vm3, %v942_v35, %v971_v44  ;;  %v889_v53 = vsel %vm334_vm1, %v876_v30, %v877_v41  ;;  %v2769_v54 = vld [vmem:[#allocation2 + $0x188] sm:$0xf0]  ;;  %v2558_v49 = vld [vmem:[#allocation2 + $0x18c] sm:$0xf0]  ;;  %v2521_v30 = vor.u32 %v2760_v55, %v2520_v48 }
  0xb8   : > { %830 = vst [vmem:[#allocation2 + $0x1dc] sm:$0xff] %v809_v50  ;;  %v890_v56 = vsel %vm885_vm2, %v3186_v26, %v889_v53  ;;  %v2557_v57 = vor.u32 %v2769_v54, %v2556_v45  ;;  %v2561_v58 = vor.u32 %v2765_v46, %v2558_v49  ;;  %v2636_v46 = vld [vmem:[#allocation2 + $0x200] sm:$0xf]  ;;  %v2600_v54 = vld [vmem:[#allocation2 + $0x1b8] sm:$0xf] }
  0xb9   : > { %998 = vst [vmem:[#allocation2 + $0x240] sm:$0xff] %v973_v52  ;;  %786 = vrot.lane.b32.xlu1 %v757_v42, %s2976_s15  ;;  %776 = vrot.lane.b32.xlu0 %v752_v43, %s2976_s15 }
  0xba   : > { %913 = vst [vmem:[#allocation2 + $0x208] sm:$0xff] %v890_v56  ;;  %401 = vrot.lane.b32.xlu2 %v3127_v10, %s2979_s18  ;;  %1525 = vmatpush.bf16.msra.mxu0 %v2557_v57  ;;  %v2564_v57 = vld [vmem:[#allocation2 + $0x170] sm:$0xf] }
  0xbb   : > { %1551 = vmatpush.bf16.msra.mxu2 %v2561_v58  ;;  %v952_v47 = vpop.permute.xlu0 %951  ;;  %v3307_v26 = vpop.permute.xlu1 %953 }
  0xbc   : > { %v966_v1 = vrot.slane %v952_v47, 4  ;;  %v967_v3 = vrot.slane %v3307_v26, 4  ;;  %v3310_v6 = vpop.permute.xlu2 %486 }
  0xbe   : > { %v980_v7 = vsel %vm334_vm1, %v966_v1, %v967_v3  ;;  %1526 = vmatpush.bf16.msra.mxu0 %v2521_v30  ;;  %v2528_v30 = vld [vmem:[#allocation2 + $0x128] sm:$0xf] }
  0xbf   : > { %v981_v9 = vsel %vm972_vm3, %v952_v47, %v980_v7  ;;  %1552 = vmatpush.bf16.msra.mxu2 %v2525_v62  ;;  %v2761_v47 = vld [vmem:[#allocation2 + $0x148] sm:$0xf0]  ;;  %v505_v62 = vrot.slane %v3310_v6, 4 }
  0xc0   : > { %1003 = vst [vmem:[#allocation2 + $0x264] sm:$0xff] %v981_v9  ;;  %v2664_v28 = vld [vmem:[#allocation2 + $0x240] sm:$0xf]  ;;  %v2792_v43 = vld [vmem:[#allocation2 + $0x244] sm:$0xf] }
  0xc1   : > { %689 = vrot.lane.b32.xlu1 %v665_v8, %s2976_s15  ;;  %411 = vrot.lane.b32.xlu0 %v3134_v11, %s2979_s18  ;;  %v2529_v8 = vor.u32 %v2761_v47, %v2528_v30 }
  0xc2   : > { %699 = vrot.lane.b32.xlu2 %v670_v12, %s2976_s15  ;;  %s2251_s15 = scalar_lea.sflag [#allocation4], %s265_s26 }
  0xc3   : > { %v3323_v16 = vpop.permute.xlu0 %695  ;;  %v574_v17 = vpop.permute.xlu1 %573 }
  0xc4   : > { %v708_v18 = vrot.slane %v3323_v16, 4  ;;  %v593_v19 = vrot.slane %v574_v17, 4  ;;  %v3326_v20 = vpop.permute.xlu2 %774 }
  0xc5   : > { %v791_v21 = vrot.slane %v3326_v20, 4 }
  0xc6   : > { %v722_v23 = vsel %vm334_vm1, %v707_v31, %v708_v18  ;;  %v603_v25 = vsel %vm334_vm1, %v593_v19, %v594_v13 }
  0xc7   : > { %v723_v33 = vsel %vm712_vm0, %v3261_v27, %v722_v23  ;;  %v604_v35 = vsel %vm515_vm4, %v574_v17, %v603_v25  ;;  %v802_v39 = vsel %vm334_vm1, %v790_v38, %v791_v21  ;;  %v2796_v42 = vld [vmem:[#allocation2 + $0x260] sm:$0xf0]  ;;  %v2666_v31 = vld [vmem:[#allocation2 + $0x264] sm:$0xf0]  ;;  %v2637_v27 = vor.u32 %v2788_v32, %v2636_v46  ;;  %v2779_v38 = vld [vmem:[#allocation2 + $0x1d8] sm:$0xf0] }
  0xc8   : > { %744 = vst [vmem:[#allocation2 + $0x194] sm:$0xff] %v723_v33  ;;  %v803_v5 = vsel %vm712_vm0, %v3201_v37, %v802_v39  ;;  %v2665_v44 = vor.u32 %v2796_v42, %v2664_v28  ;;  %v2669_v45 = vor.u32 %v2792_v43, %v2666_v31  ;;  %v2601_v49 = vor.u32 %v2779_v38, %v2600_v54 }
  0xc9   : > { %631 = vst [vmem:[#allocation2 + $0xd8] sm:$0xff] %v604_v35  ;;  %320 = vrot.lane.b32.xlu1 %v3134_v11, %s2980_s19  ;;  %310 = vrot.lane.b32.xlu0 %v3127_v10, %s2980_s19 }
  0xca   : > { %826 = vst [vmem:[#allocation2 + $0x1c0] sm:$0xff] %v803_v5  ;;  %581 = vrot.lane.b32.xlu2 %v3143_v14, %s2978_s17  ;;  %1543 = vmatpush.bf16.msra.mxu1 %v2665_v44 }
  0xcb   : > { %1569 = vmatpush.bf16.msra.mxu3 %v2669_v45  ;;  %v584_v37 = vpop.permute.xlu0 %583  ;;  %v586_v48 = vpop.permute.xlu1 %585 }
  0xcc   : > { %v598_v50 = vrot.slane %v584_v37, 4  ;;  %v599_v52 = vrot.slane %v586_v48, 4  ;;  %v3353_v53 = vpop.permute.xlu2 %587 }
  0xcd   : > { %v600_v11 = vrot.slane %v3353_v53, 4 }
  0xce   : > { %1575 = vmatpush.bf16.msrb.mxu1 %v2637_v27  ;;  %v612_v10 = vsel %vm334_vm1, %v598_v50, %v599_v52 }
  0xcf   : > { %v613_v55 = vsel %vm515_vm4, %v584_v37, %v612_v10  ;;  %v614_v56 = vsel %vm334_vm1, %v599_v52, %v600_v11  ;;  %v2770_v58 = vld [vmem:[#allocation2 + $0x190] sm:$0xf0]  ;;  %v925_v52 = vld [vmem:[%s3072_s13 + $0x2c] sm:$0xf] }
  0xd0   : > { %636 = vst [vmem:[#allocation2 + $0xfc] sm:$0xff] %v613_v55  ;;  %v615_v59 = vsel %vm515_vm4, %v586_v48, %v614_v56  ;;  %v2565_v60 = vor.u32 %v2770_v58, %v2564_v57  ;;  %v2484_v19 = vld [vmem:[#allocation2 + $0xd8] sm:$0xf]  ;;  %v2747_v32 = vld [vmem:[#allocation2 + $0xdc] sm:$0xf] }
  0xd1   : > { %637 = vst [vmem:[#allocation2 + $0x104] sm:$0xff] %v615_v59  ;;  %947 = vrot.lane.b32.xlu1 %v3143_v14, %s2977_s16  ;;  %591 = vrot.lane.b32.xlu0 %v3150_v15, %s2978_s17 }
  0xd2   : > { %1576 = vmatpush.bf16.msrb.mxu1 %v2601_v49  ;;  %957 = vrot.lane.b32.xlu2 %v3150_v15, %s2977_s16 }
  0xd3   : > { %v3369_v1 = vpop.permute.xlu0 %870  ;;  %v485_v7 = vpop.permute.xlu1 %484 }
  0xd4   : > { %v882_v9 = vrot.slane %v3369_v1, 4  ;;  %v504_v12 = vrot.slane %v485_v7, 4  ;;  %v3372_v17 = vpop.permute.xlu2 %405 }
  0xd6   : > { %1577 = vmatpush.bf16.msrb.mxu1 %v2565_v60  ;;  %v897_v14 = vsel %vm334_vm1, %v881_v63, %v882_v9  ;;  %v514_v15 = vsel %vm334_vm1, %v504_v12, %v505_v62 }
  0xd7   : > { %v898_v23 = vsel %vm885_vm2, %v3238_v61, %v897_v14  ;;  %v516_v25 = vsel %vm515_vm4, %v485_v7, %v514_v15  ;;  %v2751_v28 = vld [vmem:[#allocation2 + $0xf8] sm:$0xf0]  ;;  %v2486_v33 = vld [vmem:[#allocation2 + $0xfc] sm:$0xf0]  ;;  %v420_v14 = vrot.slane %v3372_v17, 4 }
  0xd8   : > { %918 = vst [vmem:[#allocation2 + $0x22c] sm:$0xff] %v898_v23  ;;  %v2485_v35 = vor.u32 %v2751_v28, %v2484_v19  ;;  %v2489_v39 = vor.u32 %v2747_v32, %v2486_v33 }
  0xd9   : > { %543 = vst [vmem:[#allocation2 + $0x90] sm:$0xff] %v516_v25  ;;  %502 = vrot.lane.b32.xlu1 %v3177_v24, %s2978_s17  ;;  %492 = vrot.lane.b32.xlu0 %v3173_v22, %s2978_s17 }
  0xda   : > { %1578 = vmatpush.bf16.msrb.mxu1 %v2529_v8  ;;  %403 = vrot.lane.b32.xlu2 %v3173_v22, %s2979_s18  ;;  %v2752_v8 = vld [vmem:[#allocation2 + $0x100] sm:$0xf0] }
  0xdb   : > { %1527 = vmatpush.bf16.msra.mxu0 %v2485_v35  ;;  %1553 = vmatpush.bf16.msra.mxu2 %v2489_v39  ;;  %v495_v61 = vpop.permute.xlu0 %494  ;;  %v3391_v63 = vpop.permute.xlu1 %496 }
  0xdc   : > { %v509_v42 = vrot.slane %v495_v61, 4  ;;  %v510_v43 = vrot.slane %v3391_v63, 4  ;;  %v3394_v31 = vpop.permute.xlu2 %697 }
  0xdd   : > { %v709_v5 = vrot.slane %v3394_v31, 4 }
  0xde   : > { %v524_v44 = vsel %vm334_vm1, %v509_v42, %v510_v43 }
  0xdf   : > { %v525_v45 = vsel %vm515_vm4, %v495_v61, %v524_v44  ;;  %v724_v46 = vsel %vm334_vm1, %v708_v18, %v709_v5 }
  0xe0   : > { %548 = vst [vmem:[#allocation2 + $0xb4] sm:$0xff] %v525_v45  ;;  %v725_v27 = vsel %vm712_vm0, %v3323_v16, %v724_v46  ;;  %v930_v16 = vld [vmem:[%s3072_s13 + $0x5c] sm:$0xf]  ;;  %v2448_v54 = vld [vmem:[#allocation2 + $0x90] sm:$0xf]  ;;  %v3474_v45 = vld [vmem:[%s277_s29] sm:$0xff] }
  0xe1   : > { %745 = vst [vmem:[#allocation2 + $0x19c] sm:$0xff] %v725_v27  ;;  %312 = vrot.lane.b32.xlu1 %v3173_v22, %s2980_s19  ;;  %413 = vrot.lane.b32.xlu0 %v3177_v24, %s2979_s18  ;;  %v2738_v56 = vld [vmem:[#allocation2 + $0x94] sm:$0xf]  ;;  %v1101_v46 = vunpack.c.h.b16 %v3474_v45  ;;  %v648_v27 = vld [vmem:[%s3072_s13 + $0x48] sm:$0xff]  ;;  %s2716_s29 = sshll.u32 %s3037_s25, 3 }
  0xe2   : > { %322 = vrot.lane.b32.xlu2 %v3177_v24, %s2980_s19  ;;  %658 = vst [vmem:[#allocation2 + $0x154] sm:$0xff] %v648_v27  ;;  %s2264_s12 = scalar_lea.hbm %s3927_s6, %s2716_s29  ;;  %s2931_s19 = scalar_lea.hbm %s3927_s6, 16 }
  0xe3   : > { %v3414_v38 = vpop.permute.xlu0 %784  ;;  %v3416_v37 = vpop.permute.xlu1 %577 }
  0xe4   : > { %v796_v18 = vrot.slane %v3414_v38, 4  ;;  %v595_v48 = vrot.slane %v3416_v37, 4  ;;  %v3420_v50 = vpop.permute.xlu2 %304 }
  0xe6   : > { %v810_v22 = vsel %vm334_vm1, %v795_v36, %v796_v18  ;;  %v605_v24 = vsel %vm334_vm1, %v594_v13, %v595_v48 }
  0xe7   : > { %v811_v49 = vsel %vm712_vm0, %v3277_v34, %v810_v22  ;;  %v606_v10 = vsel %vm515_vm4, %v3264_v29, %v605_v24  ;;  %v2742_v55 = vld [vmem:[#allocation2 + $0xb0] sm:$0xf0]  ;;  %v2450_v57 = vld [vmem:[#allocation2 + $0xb4] sm:$0xf0] }
  0xe8   : > { %831 = vst [vmem:[#allocation2 + $0x1e4] sm:$0xff] %v811_v49  ;;  %v2449_v36 = vor.u32 %v2742_v55, %v2448_v54  ;;  %v2453_v58 = vor.u32 %v2738_v56, %v2450_v57 }
  0xe9   : > { %632 = vst [vmem:[#allocation2 + $0xe0] sm:$0xff] %v606_v10  ;;  %959 = vrot.lane.b32.xlu1 %v930_v16, %s2977_s16  ;;  %949 = vrot.lane.b32.xlu0 %v925_v52, %s2977_s16 }
  0xea   : > { %1528 = vmatpush.bf16.msra.mxu0 %v2449_v36  ;;  %1554 = vmatpush.bf16.msra.mxu2 %v2453_v58 }
  0xeb   : > { %v398_v13 = vpop.permute.xlu1 %397  ;;  %v396_v59 = vpop.permute.xlu0 %395 }
  0xec   : > { %v416_v34 = vrot.slane %v398_v13, 4  ;;  %v415_v60 = vrot.slane %v396_v59, 4  ;;  %v3440_v29 = vpop.permute.xlu2 %316 }
  0xee   : > { %v425_v30 = vsel %vm334_vm1, %v415_v60, %v416_v34 }
  0xef   : > { %v427_v47 = vsel %vm426_vm5, %v396_v59, %v425_v30 }
  0xf0   : > { %454 = vst [vmem:[#allocation2 + $0x48] sm:$0xff] %v427_v47  ;;  %v2492_v7 = vld [vmem:[#allocation2 + $0xe0] sm:$0xf] }
  0xf1   : > { %v2493_v12 = vor.u32 %v2752_v8, %v2492_v7 }
  0xf3   : > { %1579 = vmatpush.bf16.msrb.mxu1 %v2493_v12  ;;  %v3446_v15 = vpop.permute.xlu1 %687  ;;  %v3448_v19 = vpop.permute.xlu0 %407 }
  0xf4   : > { %v704_v23 = vrot.slane %v3446_v15, 4  ;;  %v421_v25 = vrot.slane %v3448_v19, 4  ;;  %v3452_v28 = vpop.permute.xlu2 %399 }
  0xf5   : > { %v417_v32 = vrot.slane %v3452_v28, 4 }
  0xf6   : > { %v716_v33 = vsel %vm334_vm1, %v703_v2, %v704_v23  ;;  %v435_v35 = vsel %vm334_vm1, %v420_v14, %v421_v25  ;;  %v643_v2 = vld [vmem:[%s3072_s13 + $0x18] sm:$0xff] }
  0xf7   : > { %v717_v39 = vsel %vm712_vm0, %v3241_v0, %v716_v33  ;;  %v436_v61 = vsel %vm426_vm5, %v3372_v17, %v435_v35  ;;  %v428_v42 = vsel %vm334_vm1, %v416_v34, %v417_v32  ;;  %v3483_v17 = vpack.c.b16 %v1101_v46, %v1101_v46  ;;  %653 = vst [vmem:[#allocation2 + $0x130] sm:$0xff] %v643_v2  ;;  %v2412_v36 = vld [vmem:[#allocation2 + $0x48] sm:$0xf] }
  0xf8   : > { %740 = vst [vmem:[#allocation2 + $0x178] sm:$0xff] %v717_v39  ;;  %v429_v44 = vsel %vm426_vm5, %v398_v13, %v428_v42  ;;  %v324_v34 = vrot.slane %v3420_v50, 4 }
  0xf9   : > { %459 = vst [vmem:[#allocation2 + $0x6c] sm:$0xff] %v436_v61  ;;  %2699 = vmatmul.msk.bf16.vlgmr.msra.gmra.mxu3 %vm1519_vm6, %v3483_v17  ;;  %2698 = vmatmul.msk.bf16.vlgmr.msra.gmra.mxu1 %vm1519_vm6, %v3483_v17 }
  0xfa   : > { %455 = vst [vmem:[#allocation2 + $0x50] sm:$0xff] %v429_v44 }
  0xfb   : > { %v3479_v22 = vpop.permute.xlu1 %498  ;;  %v3481_v0 = vpop.permute.xlu0 %488 }
  0xfc   : > { %v511_v24 = vrot.slane %v3479_v22, 4  ;;  %v506_v16 = vrot.slane %v3481_v0, 4  ;;  %v3487_v52 = vpop.permute.xlu2 %589 }
  0xfd   : > { %v601_v54 = vrot.slane %v3487_v52, 4 }
  0xfe   : > { %v526_v49 = vsel %vm334_vm1, %v510_v43, %v511_v24  ;;  %v517_v10 = vsel %vm334_vm1, %v505_v62, %v506_v16  ;;  %v2729_v43 = vld [vmem:[#allocation2 + $0x4c] sm:$0xf] }
  0xff   : > { %v527_v55 = vsel %vm515_vm4, %v3391_v63, %v526_v49  ;;  %v518_v56 = vsel %vm515_vm4, %v3310_v6, %v517_v10  ;;  %v616_v57 = vsel %vm334_vm1, %v600_v11, %v601_v54  ;;  %v330_v6 = vrot.slane %v3440_v29, 4 }
 0x100   : > { %549 = vst [vmem:[#allocation2 + $0xbc] sm:$0xff] %v527_v55  ;;  %v617_v58 = vsel %vm515_vm4, %v3353_v53, %v616_v57  ;;  %v2733_v13 = vld [vmem:[#allocation2 + $0x68] sm:$0xf0]  ;;  %v2414_v62 = vld [vmem:[#allocation2 + $0x6c] sm:$0xf0]  ;;  %v1100_v57 = vunpack.c.l.b16 %v3474_v45 }
 0x101   : > { %544 = vst [vmem:[#allocation2 + $0x98] sm:$0xff] %v518_v56  ;;  %v2413_v59 = vor.u32 %v2733_v13, %v2412_v36  ;;  %v2417_v63 = vor.u32 %v2729_v43, %v2414_v62  ;;  %v2789_v62 = vld [vmem:[#allocation2 + $0x228] sm:$0xf0] }
 0x102   : > { %638 = vst [vmem:[#allocation2 + $0x10c] sm:$0xff] %v617_v58 }
 0x103   : > { %1529 = vmatpush.bf16.msra.mxu0 %v2413_v59  ;;  %1555 = vmatpush.bf16.msra.mxu2 %v2417_v63  ;;  %v315_v60 = vpop.permute.xlu1 %314  ;;  %v307_v11 = vpop.permute.xlu0 %306 }
 0x104   : > { %v329_v30 = vrot.slane %v315_v60, 4  ;;  %v325_v47 = vrot.slane %v307_v11, 4  ;;  %v3515_v7 = vpop.permute.xlu2 %308 }
 0x105   : > { %v326_v53 = vrot.slane %v3515_v7, 4 }
 0x106   : > { %v345_v8 = vsel %vm334_vm1, %v329_v30, %v330_v6  ;;  %v335_v12 = vsel %vm334_vm1, %v324_v34, %v325_v47  ;;  %v2780_v30 = vld [vmem:[#allocation2 + $0x1e0] sm:$0xf0] }
 0x107   : > { %v346_v14 = vsel %vm336_vm7, %v315_v60, %v345_v8  ;;  %v337_v33 = vsel %vm336_vm7, %v3420_v50, %v335_v12  ;;  %v338_v35 = vsel %vm334_vm1, %v325_v47, %v326_v53  ;;  %v2743_v39 = vld [vmem:[#allocation2 + $0xb8] sm:$0xf0] }
 0x108   : > { %370 = vst [vmem:[#allocation2 + $0x24] sm:$0xff] %v346_v14  ;;  %v339_v61 = vsel %vm336_vm7, %v307_v11, %v338_v35  ;;  %v2456_v42 = vld [vmem:[#allocation2 + $0x98] sm:$0xf]  ;;  %v2608_v14 = vld [vmem:[#allocation2 + $0x1c0] sm:$0xf] }
 0x109   : > { %364 = vst [vmem:[#allocation2] sm:$0xff] %v337_v33  ;;  %v2457_v44 = vor.u32 %v2743_v39, %v2456_v42  ;;  %v2609_v39 = vor.u32 %v2780_v30, %v2608_v14  ;;  %v2646_v42 = vld [vmem:[#allocation2 + $0x22c] sm:$0xf0] }
 0x10a   : > { %365 = vst [vmem:[#allocation2 + $0x8] sm:$0xff] %v339_v61  ;;  %v2638_v61 = vld [vmem:[#allocation2 + $0x224] sm:$0xf0] }
 0x10b   : > { %1580 = vmatpush.bf16.msrb.mxu1 %v2457_v44  ;;  %v3529_v2 = vpop.permute.xlu1 %955  ;;  %v3531_v46 = vpop.permute.xlu0 %945 }
 0x10c   : > { %v968_v27 = vrot.slane %v3529_v2, 4  ;;  %v963_v50 = vrot.slane %v3531_v46, 4  ;;  %v3535_v49 = vpop.permute.xlu2 %500 }
 0x10d   : > { %v512_v10 = vrot.slane %v3535_v49, 4 }
 0x10e   : > { %v982_v55 = vsel %vm334_vm1, %v967_v3, %v968_v27  ;;  %v974_v56 = vsel %vm334_vm1, %v962_v4, %v963_v50 }
 0x10f   : > { %v983_v36 = vsel %vm972_vm3, %v3307_v26, %v982_v55  ;;  %v975_v43 = vsel %vm972_vm3, %v3225_v51, %v974_v56  ;;  %v528_v58 = vsel %vm334_vm1, %v511_v24, %v512_v10  ;;  %v2724_v13 = vld [vmem:[#allocation2 + $0x20] sm:$0xf0]  ;;  %v2378_v3 = vld [vmem:[#allocation2 + $0x24] sm:$0xf0]  ;;  %v3558_v51 = vpack.c.b16 %v1100_v57, %v1100_v57 }
 0x110   : > { %1004 = vst [vmem:[#allocation2 + $0x26c] sm:$0xff] %v983_v36  ;;  %v529_v59 = vsel %vm515_vm4, %v3479_v22, %v528_v58  ;;  %v2376_v4 = vld [vmem:[#allocation2] sm:$0xf]  ;;  %v2720_v63 = vld [vmem:[#allocation2 + $0x4] sm:$0xf] }
 0x111   : > { %999 = vst [vmem:[#allocation2 + $0x248] sm:$0xff] %v975_v43  ;;  %v2377_v45 = vor.u32 %v2724_v13, %v2376_v4  ;;  %v2381_v34 = vor.u32 %v2720_v63, %v2378_v3  ;;  %v2644_v26 = vld [vmem:[#allocation2 + $0x208] sm:$0xf]  ;;  %v2784_v57 = vld [vmem:[#allocation2 + $0x204] sm:$0xf] }
 0x112   : > { %550 = vst [vmem:[#allocation2 + $0xc4] sm:$0xff] %v529_v59  ;;  %v2645_v60 = vor.u32 %v2789_v62, %v2644_v26  ;;  %v2572_v36 = vld [vmem:[#allocation2 + $0x178] sm:$0xf]  ;;  %v2771_v43 = vld [vmem:[#allocation2 + $0x198] sm:$0xf0] }
 0x113   : > { %1530 = vmatpush.bf16.msra.mxu0 %v2377_v45  ;;  %1556 = vmatpush.bf16.msra.mxu2 %v2381_v34  ;;  %v3560_v24 = vpop.permute.xlu1 %579  ;;  %v3562_v11 = vpop.permute.xlu0 %409  ;;  %v2536_v62 = vld [vmem:[#allocation2 + $0x130] sm:$0xf]  ;;  %v2762_v59 = vld [vmem:[#allocation2 + $0x150] sm:$0xf0]  ;;  %v2573_v4 = vor.u32 %v2771_v43, %v2572_v36  ;;  %v2785_v63 = vld [vmem:[#allocation2 + $0x20c] sm:$0xf] }
 0x114   : > { %v596_v47 = vrot.slane %v3560_v24, 4  ;;  %v422_v22 = vrot.slane %v3562_v11, 4  ;;  %v3566_v8 = vpop.permute.xlu2 %401  ;;  %v2649_v26 = vor.u32 %v2785_v63, %v2646_v42  ;;  %v2538_v63 = vld [vmem:[#allocation2 + $0x154] sm:$0xf0] }
 0x115   : > { %v418_v12 = vrot.slane %v3566_v8, 4 }
 0x116   : > { %v607_v33 = vsel %vm334_vm1, %v595_v48, %v596_v47  ;;  %v437_v35 = vsel %vm334_vm1, %v421_v25, %v422_v22  ;;  %1531 = vmatmul.bf16.vlgmr.msra.gmra.mxu0 %v3558_v51  ;;  %1557 = vmatmul.bf16.vlgmr.msra.gmra.mxu2 %v3558_v51 }
 0x117   : > { %1627 = vmatpush.bf16.msrb.mxu2 %v2645_v60  ;;  %v608_v44 = vsel %vm515_vm4, %v3416_v37, %v607_v33  ;;  %v438_v55 = vsel %vm426_vm5, %v3448_v19, %v437_v35  ;;  %v430_v48 = vsel %vm334_vm1, %v417_v32, %v418_v12  ;;  %v2797_v25 = vld [vmem:[#allocation2 + $0x268] sm:$0xf0]  ;;  %v2674_v56 = vld [vmem:[#allocation2 + $0x26c] sm:$0xf0]  ;;  %v2641_v32 = vor.u32 %v2784_v57, %v2638_v61  ;;  %v2602_v60 = vld [vmem:[#allocation2 + $0x1dc] sm:$0xf0] }
 0x118   : > { %633 = vst [vmem:[#allocation2 + $0xe8] sm:$0xff] %v608_v44  ;;  %v431_v58 = vsel %vm426_vm5, %v3452_v28, %v430_v48  ;;  %v2672_v37 = vld [vmem:[#allocation2 + $0x248] sm:$0xf]  ;;  %v2793_v13 = vld [vmem:[#allocation2 + $0x24c] sm:$0xf]  ;;  %v2537_v33 = vor.u32 %v2762_v59, %v2536_v62 }
 0x119   : > { %460 = vst [vmem:[#allocation2 + $0x74] sm:$0xff] %v438_v55  ;;  %v2673_v19 = vor.u32 %v2797_v25, %v2672_v37  ;;  %v2677_v3 = vor.u32 %v2793_v13, %v2674_v56  ;;  %v2610_v35 = vld [vmem:[#allocation2 + $0x1e4] sm:$0xf0]  ;;  %v2775_v61 = vld [vmem:[#allocation2 + $0x1bc] sm:$0xf] }
 0x11a   : > { %456 = vst [vmem:[#allocation2 + $0x58] sm:$0xff] %v431_v58  ;;  %v2605_v55 = vor.u32 %v2775_v61, %v2602_v60  ;;  %v2776_v48 = vld [vmem:[#allocation2 + $0x1c4] sm:$0xf]  ;;  %v2566_v25 = vld [vmem:[#allocation2 + $0x194] sm:$0xf0] }
 0x11b   : > { %1628 = vmatpush.bf16.msrb.mxu2 %v2609_v39  ;;  %1595 = vmatpush.bf16.msrb.mxu3 %v2673_v19  ;;  %v873_v45 = vpop.permute.xlu1 %872  ;;  %v863_v34 = vpop.permute.xlu0 %862  ;;  %v2613_v36 = vor.u32 %v2776_v48, %v2610_v35  ;;  %v2753_v58 = vld [vmem:[#allocation2 + $0x108] sm:$0xf0]  ;;  %v2767_v37 = vld [vmem:[#allocation2 + $0x17c] sm:$0xf]  ;;  %v2420_v19 = vld [vmem:[#allocation2 + $0x50] sm:$0xf] }
 0x11c   : > { %1621 = vmatpush.bf16.msrb.mxu0 %v2677_v3  ;;  %v883_v28 = vrot.slane %v873_v45, 4  ;;  %920 = vst.msk [vmem:[#allocation2 + $0x23c] sm:$0xf] %vm368_vm8, %v873_v45  ;;  %v878_v30 = vrot.slane %v863_v34, 4  ;;  %v700_v14 = vpop.permute.xlu2 %699  ;;  %v2574_v62 = vld [vmem:[#allocation2 + $0x19c] sm:$0xf0] }
 0x11d   : > { %915 = vst.msk [vmem:[#allocation2 + $0x218] sm:$0xf] %vm368_vm8, %v863_v34  ;;  %v710_v39 = vrot.slane %v700_v14, 4  ;;  %v2757_v59 = vld [vmem:[#allocation2 + $0x12c] sm:$0xf] }
 0x11e   : > { %v899_v44 = vsel %vm334_vm1, %v882_v9, %v883_v28  ;;  %v891_v42 = vsel %vm334_vm1, %v877_v41, %v878_v30  ;;  %747 = vst.msk [vmem:[#allocation2 + $0x1ac] sm:$0xf] %vm368_vm8, %v700_v14  ;;  %2700 = vmatmul.msk.bf16.vlgmr.msrb.gmra.mxu3 %vm1519_vm6, %v3483_v17  ;;  %v2766_v41 = vld [vmem:[#allocation2 + $0x174] sm:$0xf] }
 0x11f   : > { %1601 = vmatpush.bf16.msra.mxu3 %v2641_v32  ;;  %1629 = vmatpush.bf16.msrb.mxu2 %v2573_v4  ;;  %v900_v56 = vsel %vm885_vm2, %v3369_v1, %v899_v44  ;;  %v892_v57 = vsel %vm885_vm2, %v3280_v40, %v891_v42  ;;  %v726_v9 = vsel %vm334_vm1, %v709_v5, %v710_v39  ;;  %v2500_v43 = vld [vmem:[#allocation2 + $0xe8] sm:$0xf]  ;;  %v2530_v5 = vld [vmem:[#allocation2 + $0x14c] sm:$0xf0]  ;;  %v2758_v4 = vld [vmem:[#allocation2 + $0x134] sm:$0xf] }
 0x120   : > { %1653 = vmatpush.bf16.msra.mxu0 %v2649_v26  ;;  %919 = vst [vmem:[#allocation2 + $0x234] sm:$0xff] %v900_v56  ;;  %v727_v13 = vsel %vm712_vm0, %v3394_v31, %v726_v9  ;;  %v2734_v1 = vld [vmem:[#allocation2 + $0x70] sm:$0xf0]  ;;  %v2501_v3 = vor.u32 %v2753_v58, %v2500_v43  ;;  %v2569_v32 = vor.u32 %v2766_v41, %v2566_v25  ;;  %v2749_v48 = vld [vmem:[#allocation2 + $0xec] sm:$0xf] }
 0x121   : > { %914 = vst [vmem:[#allocation2 + $0x210] sm:$0xff] %v892_v57  ;;  %v2421_v40 = vor.u32 %v2734_v1, %v2420_v19  ;;  %v2577_v31 = vor.u32 %v2767_v37, %v2574_v62  ;;  %v2533_v30 = vor.u32 %v2757_v59, %v2530_v5  ;;  %v2502_v25 = vld [vmem:[#allocation2 + $0x10c] sm:$0xf0]  ;;  %v2739_v56 = vld [vmem:[#allocation2 + $0x9c] sm:$0xf] }
 0x122   : > { %746 = vst [vmem:[#allocation2 + $0x1a4] sm:$0xff] %v727_v13  ;;  %v2505_v9 = vor.u32 %v2749_v48, %v2502_v25  ;;  %v649_v37 = vld [vmem:[%s3072_s13 + $0x50] sm:$0xff]  ;;  %v2744_v19 = vld [vmem:[#allocation2 + $0xc0] sm:$0xf0]  ;;  %v2422_v59 = vld [vmem:[#allocation2 + $0x74] sm:$0xf0] }
 0x123   : > { %1602 = vmatpush.bf16.msra.mxu3 %v2605_v55  ;;  %1630 = vmatpush.bf16.msrb.mxu2 %v2537_v33  ;;  %v3612_v45 = vpop.permute.xlu1 %490  ;;  %v3614_v34 = vpop.permute.xlu0 %318  ;;  %v2541_v33 = vor.u32 %v2758_v4, %v2538_v63  ;;  %659 = vst [vmem:[#allocation2 + $0x15c] sm:$0xff] %v649_v37 }
 0x124   : > { %1654 = vmatpush.bf16.msra.mxu0 %v2613_v36  ;;  %1581 = vmatpush.bf16.msrb.mxu1 %v2421_v40  ;;  %v507_v26 = vrot.slane %v3612_v45, 4  ;;  %v331_v60 = vrot.slane %v3614_v34, 4  ;;  %v582_v28 = vpop.permute.xlu2 %581  ;;  %v2458_v36 = vld [vmem:[#allocation2 + $0xbc] sm:$0xf0]  ;;  %v2466_v40 = vld [vmem:[#allocation2 + $0xc4] sm:$0xf0] }
 0x125   : > { %v597_v14 = vrot.slane %v582_v28, 4  ;;  %v2461_v62 = vor.u32 %v2739_v56, %v2458_v36 }
 0x126   : > { %v519_v35 = vsel %vm334_vm1, %v506_v16, %v507_v26  ;;  %v347_v39 = vsel %vm334_vm1, %v330_v6, %v331_v60  ;;  %2701 = vmatmul.msk.bf16.vlgmr.msrb.gmra.mxu0 %vm1519_vm6, %v3483_v17  ;;  %v2748_v16 = vld [vmem:[#allocation2 + $0xe4] sm:$0xf] }
 0x127   : > { %1603 = vmatpush.bf16.msra.mxu3 %v2569_v32  ;;  %1631 = vmatpush.bf16.msrb.mxu2 %v2501_v3  ;;  %v520_v61 = vsel %vm515_vm4, %v3481_v0, %v519_v35  ;;  %v348_v44 = vsel %vm336_vm7, %v3440_v29, %v347_v39  ;;  %v609_v42 = vsel %vm334_vm1, %v596_v47, %v597_v14  ;;  %v2494_v0 = vld [vmem:[#allocation2 + $0x104] sm:$0xf0] }
 0x128   : > { %1655 = vmatpush.bf16.msra.mxu0 %v2577_v31  ;;  %545 = vst [vmem:[#allocation2 + $0xa0] sm:$0xff] %v520_v61  ;;  %v610_v55 = vsel %vm515_vm4, %v3560_v24, %v609_v42  ;;  %v611_v6 = vsel %vm515_vm4, %v582_v28, %v597_v14  ;;  %v2497_v29 = vor.u32 %v2748_v16, %v2494_v0  ;;  %v3642_v24 = vld [vmem:[%s3072_s13 + $0x20] sm:$0xff]  ;;  %v2384_v31 = vld [vmem:[#allocation2 + $0x8] sm:$0xf]  ;;  %v2730_v14 = vld [vmem:[#allocation2 + $0x54] sm:$0xf] }
 0x129   : > { %371 = vst [vmem:[#allocation2 + $0x2c] sm:$0xff] %v348_v44  ;;  %v2790_v61 = vld [vmem:[#allocation2 + $0x230] sm:$0xf0]  ;;  %v2652_v16 = vld [vmem:[#allocation2 + $0x210] sm:$0xf] }
 0x12a   : > { %634 = vst [vmem:[#allocation2 + $0xf0] sm:$0xff] %v610_v55 }
 0x12b   : > { %1604 = vmatpush.bf16.msra.mxu3 %v2533_v30  ;;  %635 = vst.msk [vmem:[#allocation2 + $0xf8] sm:$0xf] %vm368_vm8, %v611_v6  ;;  %v787_v47 = vpop.permute.xlu1 %786  ;;  %v777_v57 = vpop.permute.xlu0 %776  ;;  %v2721_v6 = vld [vmem:[#allocation2 + $0xc] sm:$0xf] }
 0x12c   : > { %1656 = vmatpush.bf16.msra.mxu0 %v2541_v33  ;;  %v797_v41 = vrot.slane %v787_v47, 4  ;;  %833 = vst.msk [vmem:[#allocation2 + $0x1f4] sm:$0xf] %vm368_vm8, %v787_v47  ;;  %v792_v43 = vrot.slane %v777_v57, 4  ;;  %v3645_v58 = vpop.permute.xlu2 %957  ;;  %v2425_v33 = vor.u32 %v2730_v14, %v2422_v59 }
 0x12d   : > { %828 = vst.msk [vmem:[#allocation2 + $0x1d0] sm:$0xf] %vm368_vm8, %v777_v57  ;;  %v969_v13 = vrot.slane %v3645_v58, 4 }
 0x12e   : > { %v812_v1 = vsel %vm334_vm1, %v796_v18, %v797_v41  ;;  %v804_v3 = vsel %vm334_vm1, %v791_v21, %v792_v43  ;;  %654 = vst [vmem:[#allocation2 + $0x138] sm:$0xff] %v3642_v24 }
 0x12f   : > { %1605 = vmatpush.bf16.msra.mxu3 %v2497_v29  ;;  %v813_v5 = vsel %vm712_vm0, %v3414_v38, %v812_v1  ;;  %v805_v32 = vsel %vm712_vm0, %v3326_v20, %v804_v3  ;;  %v984_v18 = vsel %vm334_vm1, %v968_v27, %v969_v13  ;;  %v2464_v4 = vld [vmem:[#allocation2 + $0xa0] sm:$0xf]  ;;  %v2740_v63 = vld [vmem:[#allocation2 + $0xa4] sm:$0xf]  ;;  %v2428_v3 = vld [vmem:[#allocation2 + $0x58] sm:$0xf] }
 0x130   : > { %1657 = vmatpush.bf16.msra.mxu0 %v2505_v9  ;;  %832 = vst [vmem:[#allocation2 + $0x1ec] sm:$0xff] %v813_v5  ;;  %v985_v21 = vsel %vm972_vm3, %v3529_v2, %v984_v18  ;;  %v2725_v28 = vld [vmem:[#allocation2 + $0x28] sm:$0xf0]  ;;  %v2465_v38 = vor.u32 %v2744_v19, %v2464_v4  ;;  %v2469_v30 = vor.u32 %v2740_v63, %v2466_v40  ;;  %v2386_v39 = vld [vmem:[#allocation2 + $0x2c] sm:$0xf0] }
 0x131   : > { %827 = vst [vmem:[#allocation2 + $0x1c8] sm:$0xff] %v805_v32  ;;  %v2385_v20 = vor.u32 %v2725_v28, %v2384_v31  ;;  %v2389_v29 = vor.u32 %v2721_v6, %v2386_v39  ;;  %v2772_v40 = vld [vmem:[#allocation2 + $0x1a0] sm:$0xf0] }
 0x132   : > { %1005 = vst [vmem:[#allocation2 + $0x274] sm:$0xff] %v985_v21  ;;  %1632 = vmatpush.bf16.msrb.mxu2 %v2465_v38 }
 0x133   : > { %1606 = vmatpush.bf16.msra.mxu3 %v2461_v62  ;;  %1582 = vmatpush.bf16.msrb.mxu1 %v2385_v20  ;;  %v690_v27 = vpop.permute.xlu1 %689  ;;  %v3668_v35 = vpop.permute.xlu0 %411  ;;  %v2731_v62 = vld [vmem:[#allocation2 + $0x5c] sm:$0xf] }
 0x134   : > { %1658 = vmatpush.bf16.msra.mxu0 %v2469_v30  ;;  %v705_v44 = vrot.slane %v690_v27, 4  ;;  %742 = vst.msk [vmem:[#allocation2 + $0x188] sm:$0xf] %vm368_vm8, %v690_v27  ;;  %v423_v2 = vrot.slane %v3668_v35, 4  ;;  %v404_v42 = vpop.permute.xlu2 %403 }
 0x135   : > { %v419_v55 = vrot.slane %v404_v42, 4  ;;  %v2544_v4 = vld [vmem:[#allocation2 + $0x138] sm:$0xf] }
 0x136   : > { %v718_v48 = vsel %vm334_vm1, %v704_v23, %v705_v44  ;;  %v439_v0 = vsel %vm334_vm1, %v422_v22, %v423_v2  ;;  %1583 = vmatmul.bf16.vlgmr.msrb.gmra.mxu1 %v3558_v51  ;;  %v2653_v23 = vor.u32 %v2790_v61, %v2652_v16 }
 0x137   : > { %1607 = vmatpush.bf16.msra.mxu3 %v2425_v33  ;;  %v719_v25 = vsel %vm712_vm0, %v3446_v15, %v718_v48  ;;  %v440_v56 = vsel %vm426_vm5, %v3562_v11, %v439_v0  ;;  %v432_v47 = vsel %vm334_vm1, %v418_v12, %v419_v55  ;;  %v434_v22 = vsel %vm426_vm5, %v404_v42, %v419_v55  ;;  %v2781_v36 = vld [vmem:[#allocation2 + $0x1e8] sm:$0xf0] }
 0x138   : > { %741 = vst [vmem:[#allocation2 + $0x180] sm:$0xff] %v719_v25  ;;  %v433_v57 = vsel %vm426_vm5, %v3566_v8, %v432_v47  ;;  %v2616_v9 = vld [vmem:[#allocation2 + $0x1c8] sm:$0xf] }
 0x139   : > { %461 = vst [vmem:[#allocation2 + $0x7c] sm:$0xff] %v440_v56  ;;  %v2617_v41 = vor.u32 %v2781_v36, %v2616_v9 }
 0x13a   : > { %457 = vst [vmem:[#allocation2 + $0x60] sm:$0xff] %v433_v57  ;;  %v2682_v57 = vld [vmem:[#allocation2 + $0x274] sm:$0xf0] }
 0x13b   : > { %1608 = vmatpush.bf16.msra.mxu3 %v2389_v29  ;;  %458 = vst.msk [vmem:[#allocation2 + $0x68] sm:$0xf] %vm368_vm8, %v434_v22  ;;  %v321_v15 = vpop.permute.xlu1 %320  ;;  %v3692_v11 = vpop.permute.xlu0 %310 }
 0x13c   : > { %v332_v12 = vrot.slane %v321_v15, 4  ;;  %v327_v43 = vrot.slane %v3692_v11, 4  ;;  %v323_v8 = vpop.permute.xlu2 %322 }
 0x13d   : > { %v333_v37 = vrot.slane %v323_v8, 4 }
 0x13e   : > { %1609 = vmatmul.bf16.vlgmr.msra.gmra.mxu3 %v3558_v51  ;;  %v349_v19 = vsel %vm334_vm1, %v331_v60, %v332_v12  ;;  %v340_v1 = vsel %vm334_vm1, %v326_v53, %v327_v43  ;;  %v2763_v60 = vld [vmem:[#allocation2 + $0x158] sm:$0xf0] }
 0x13f   : > { %1679 = vmatpush.bf16.msrb.mxu3 %v2653_v23  ;;  %v350_v59 = vsel %vm336_vm7, %v3614_v34, %v349_v19  ;;  %v341_v5 = vsel %vm336_vm7, %v3515_v7, %v340_v1  ;;  %v351_v32 = vsel %vm334_vm1, %v332_v12, %v333_v37  ;;  %v2580_v18 = vld [vmem:[#allocation2 + $0x180] sm:$0xf]  ;;  %v353_v21 = vsel %vm336_vm7, %v323_v8, %v333_v37  ;;  %v2798_v23 = vld [vmem:[#allocation2 + $0x270] sm:$0xf0]  ;;  %v2508_v8 = vld [vmem:[#allocation2 + $0xf0] sm:$0xf] }
 0x140   : > { %372 = vst [vmem:[#allocation2 + $0x34] sm:$0xff] %v350_v59  ;;  %v352_v63 = vsel %vm336_vm7, %v321_v15, %v351_v32  ;;  %v2735_v53 = vld [vmem:[#allocation2 + $0x78] sm:$0xf0]  ;;  %v2430_v31 = vld [vmem:[#allocation2 + $0x7c] sm:$0xf0]  ;;  %v2581_v28 = vor.u32 %v2772_v40, %v2580_v18  ;;  %v2545_v34 = vor.u32 %v2763_v60, %v2544_v4 }
 0x141   : > { %366 = vst [vmem:[#allocation2 + $0x10] sm:$0xff] %v341_v5  ;;  %v2429_v38 = vor.u32 %v2735_v53, %v2428_v3  ;;  %v2433_v30 = vor.u32 %v2731_v62, %v2430_v31  ;;  %v645_v1 = vld [vmem:[%s3072_s13 + $0x28] sm:$0xf]  ;;  %v650_v3 = vld [vmem:[%s3072_s13 + $0x58] sm:$0xf] }
 0x142   : > { %373 = vst [vmem:[#allocation2 + $0x3c] sm:$0xff] %v352_v63  ;;  %v2777_v32 = vld [vmem:[#allocation2 + $0x1cc] sm:$0xf]  ;;  %v2618_v18 = vld [vmem:[#allocation2 + $0x1ec] sm:$0xf0] }
 0x143   : > { %1680 = vmatpush.bf16.msrb.mxu3 %v2617_v41  ;;  %374 = vst.msk [vmem:[#allocation2 + $0x44] sm:$0xf] %vm368_vm8, %v353_v21  ;;  %1633 = vmatpush.bf16.msrb.mxu2 %v2429_v38  ;;  %v3712_v7 = vpop.permute.xlu1 %947  ;;  %v592_v20 = vpop.permute.xlu0 %591  ;;  %v2786_v41 = vld [vmem:[#allocation2 + $0x214] sm:$0xf]  ;;  %v2621_v38 = vor.u32 %v2777_v32, %v2618_v18 }
 0x144   : > { %1659 = vmatpush.bf16.msra.mxu0 %v2433_v30  ;;  %v964_v14 = vrot.slane %v3712_v7, 4  ;;  %v602_v33 = vrot.slane %v592_v20, 4  ;;  %655 = vst.msk [vmem:[#allocation2 + $0x140] sm:$0xf] %vm368_vm8, %v645_v1 }
 0x145   : > { %660 = vst.msk [vmem:[#allocation2 + $0x164] sm:$0xf] %vm368_vm8, %v650_v3 }
 0x146   : > { %v976_v27 = vsel %vm334_vm1, %v963_v50, %v964_v14  ;;  %v618_v39 = vsel %vm334_vm1, %v601_v54, %v602_v33  ;;  %v620_v61 = vsel %vm515_vm4, %v592_v20, %v602_v33  ;;  %v2582_v20 = vld [vmem:[#allocation2 + $0x1a4] sm:$0xf0]  ;;  %v2759_v33 = vld [vmem:[#allocation2 + $0x13c] sm:$0xf] }
 0x147   : > { %1681 = vmatpush.bf16.msrb.mxu3 %v2581_v28  ;;  %v977_v44 = vsel %vm972_vm3, %v3531_v46, %v976_v27  ;;  %v619_v42 = vsel %vm515_vm4, %v3487_v52, %v618_v39  ;;  %640 = vst.msk [vmem:[#allocation2 + $0x11c] sm:$0xf] %vm368_vm8, %v620_v61  ;;  %v2726_v16 = vld [vmem:[#allocation2 + $0x30] sm:$0xf0]  ;;  %v2394_v55 = vld [vmem:[#allocation2 + $0x34] sm:$0xf0] }
 0x148   : > { %1000 = vst [vmem:[#allocation2 + $0x250] sm:$0xff] %v977_v44  ;;  %v2392_v6 = vld [vmem:[#allocation2 + $0x10] sm:$0xf]  ;;  %v2722_v50 = vld [vmem:[#allocation2 + $0x14] sm:$0xf] }
 0x149   : > { %639 = vst [vmem:[#allocation2 + $0x114] sm:$0xff] %v619_v42  ;;  %v2393_v48 = vor.u32 %v2726_v16, %v2392_v6  ;;  %v2397_v0 = vor.u32 %v2722_v50, %v2394_v55  ;;  %v2546_v27 = vld [vmem:[#allocation2 + $0x15c] sm:$0xf0] }
 0x14a   : > { %v2549_v16 = vor.u32 %v2759_v33, %v2546_v27  ;;  %v2436_v50 = vld [vmem:[#allocation2 + $0x60] sm:$0xf]  ;;  %v2728_v27 = vld [vmem:[#allocation2 + $0x40] sm:$0xf0] }
 0x14b   : > { %1682 = vmatpush.bf16.msrb.mxu3 %v2545_v34  ;;  %1634 = vmatpush.bf16.msrb.mxu2 %v2393_v48  ;;  %v503_v54 = vpop.permute.xlu1 %502  ;;  %v493_v29 = vpop.permute.xlu0 %492  ;;  %v2768_v34 = vld [vmem:[#allocation2 + $0x184] sm:$0xf]  ;;  %v2552_v32 = vld [vmem:[#allocation2 + $0x140] sm:$0xf] }
 0x14c   : > { %1660 = vmatpush.bf16.msra.mxu0 %v2397_v0  ;;  %v513_v25 = vrot.slane %v503_v54, 4  ;;  %v508_v56 = vrot.slane %v493_v29, 4  ;;  %v2585_v61 = vor.u32 %v2768_v34, %v2582_v20  ;;  %v2764_v18 = vld [vmem:[#allocation2 + $0x160] sm:$0xf0] }
 0x14e   : > { %v530_v52 = vsel %vm334_vm1, %v512_v10, %v513_v25  ;;  %v532_v46 = vsel %vm515_vm4, %v503_v54, %v513_v25  ;;  %v521_v47 = vsel %vm334_vm1, %v507_v26, %v508_v56  ;;  %1635 = vmatmul.bf16.vlgmr.msrb.gmra.mxu2 %v3558_v51  ;;  %v523_v9 = vsel %vm515_vm4, %v493_v29, %v508_v56  ;;  %v2654_v26 = vld [vmem:[#allocation2 + $0x234] sm:$0xf0]  ;;  %v2750_v29 = vld [vmem:[#allocation2 + $0xf4] sm:$0xf] }
 0x14f   : > { %v531_v22 = vsel %vm515_vm4, %v3535_v49, %v530_v52  ;;  %552 = vst.msk [vmem:[#allocation2 + $0xd4] sm:$0xf] %vm368_vm8, %v532_v46  ;;  %v522_v10 = vsel %vm515_vm4, %v3612_v45, %v521_v47  ;;  %v2680_v36 = vld [vmem:[#allocation2 + $0x250] sm:$0xf]  ;;  %v2794_v15 = vld [vmem:[#allocation2 + $0x254] sm:$0xf]  ;;  %1661 = vmatmul.bf16.vlgmr.msra.gmra.mxu0 %v3558_v51  ;;  %v2657_v5 = vor.u32 %v2786_v41, %v2654_v26 }
 0x150   : > { %551 = vst [vmem:[#allocation2 + $0xcc] sm:$0xff] %v531_v22  ;;  %v2681_v12 = vor.u32 %v2798_v23, %v2680_v36  ;;  %v2754_v37 = vld [vmem:[#allocation2 + $0x110] sm:$0xf0]  ;;  %v2685_v49 = vor.u32 %v2794_v15, %v2682_v57  ;;  %v2510_v54 = vld [vmem:[#allocation2 + $0x114] sm:$0xf0] }
 0x151   : > { %546 = vst [vmem:[#allocation2 + $0xa8] sm:$0xff] %v522_v10  ;;  %v2509_v19 = vor.u32 %v2754_v37, %v2508_v8  ;;  %v2513_v56 = vor.u32 %v2750_v29, %v2510_v54  ;;  %v2791_v23 = vld [vmem:[#allocation2 + $0x238] sm:$0xf0]  ;;  %v2660_v10 = vld [vmem:[#allocation2 + $0x218] sm:$0xf] }
 0x152   : > { %547 = vst.msk [vmem:[#allocation2 + $0xb0] sm:$0xf] %vm368_vm8, %v523_v9  ;;  %1647 = vmatpush.bf16.msra.mxu1 %v2681_v12  ;;  %v2661_v8 = vor.u32 %v2791_v23, %v2660_v10  ;;  %v2732_v37 = vld [vmem:[#allocation2 + $0x64] sm:$0xf] }
 0x153   : > { %1683 = vmatpush.bf16.msrb.mxu3 %v2509_v19  ;;  %v313_v45 = vpop.permute.xlu1 %312  ;;  %v414_v62 = vpop.permute.xlu0 %413  ;;  %v2782_v19 = vld [vmem:[#allocation2 + $0x1f0] sm:$0xf0] }
 0x154   : > { %v328_v40 = vrot.slane %v313_v45, 4  ;;  %v424_v59 = vrot.slane %v414_v62, 4 }
 0x155   : > { %2702 = vmatmul.msk.bf16.vlgmr.msra.gmra.mxu1 %vm1519_vm6, %v3483_v17 }
 0x156   : > { %1673 = vmatpush.bf16.msrb.mxu1 %v2685_v49  ;;  %v342_v4 = vsel %vm334_vm1, %v327_v43, %v328_v40  ;;  %v344_v60 = vsel %vm336_vm7, %v313_v45, %v328_v40  ;;  %v441_v63 = vsel %vm334_vm1, %v423_v2, %v424_v59  ;;  %v443_v31 = vsel %vm426_vm5, %v414_v62, %v424_v59  ;;  %v2624_v49 = vld [vmem:[#allocation2 + $0x1d0] sm:$0xf]  ;;  %v2402_v62 = vld [vmem:[#allocation2 + $0x3c] sm:$0xf0]  ;;  %v2588_v40 = vld [vmem:[#allocation2 + $0x188] sm:$0xf] }
 0x157   : > { %v343_v21 = vsel %vm336_vm7, %v3692_v11, %v342_v4  ;;  %369 = vst.msk [vmem:[#allocation2 + $0x20] sm:$0xf] %vm368_vm8, %v344_v60  ;;  %v442_v53 = vsel %vm426_vm5, %v3668_v35, %v441_v63  ;;  %v2745_v28 = vld [vmem:[#allocation2 + $0xc8] sm:$0xf0]  ;;  %v2474_v47 = vld [vmem:[#allocation2 + $0xcc] sm:$0xf0]  ;;  %v2625_v45 = vor.u32 %v2782_v19, %v2624_v49  ;;  %v2553_v60 = vor.u32 %v2764_v18, %v2552_v32 }
 0x158   : > { %367 = vst [vmem:[#allocation2 + $0x18] sm:$0xff] %v343_v21  ;;  %v2472_v43 = vld [vmem:[#allocation2 + $0xa8] sm:$0xf]  ;;  %v2773_v59 = vld [vmem:[#allocation2 + $0x1a8] sm:$0xf0] }
 0x159   : > { %462 = vst [vmem:[#allocation2 + $0x84] sm:$0xff] %v442_v53  ;;  %v2473_v30 = vor.u32 %v2745_v28, %v2472_v43  ;;  %v2589_v4 = vor.u32 %v2773_v59, %v2588_v40  ;;  %v2516_v63 = vld [vmem:[#allocation2 + $0xf8] sm:$0xf]  ;;  %v2755_v21 = vld [vmem:[#allocation2 + $0x118] sm:$0xf0] }
 0x15a   : > { %1705 = vmatpush.bf16.msra.mxu1 %v2657_v5  ;;  %463 = vst.msk [vmem:[#allocation2 + $0x8c] sm:$0xf] %vm368_vm8, %v443_v31  ;;  %v2517_v53 = vor.u32 %v2755_v21, %v2516_v63  ;;  %v2480_v28 = vld [vmem:[#allocation2 + $0xb0] sm:$0xf]  ;;  %v2746_v43 = vld [vmem:[#allocation2 + $0xd0] sm:$0xf0] }
 0x15b   : > { %1684 = vmatpush.bf16.msrb.mxu3 %v2473_v30  ;;  %v960_v2 = vpop.permute.xlu1 %959  ;;  %v950_v11 = vpop.permute.xlu0 %949  ;;  %v2444_v30 = vld [vmem:[#allocation2 + $0x68] sm:$0xf] }
 0x15c   : > { %v970_v39 = vrot.slane %v960_v2, 4  ;;  %1007 = vst.msk [vmem:[#allocation2 + $0x284] sm:$0xf] %vm368_vm8, %v960_v2  ;;  %v965_v35 = vrot.slane %v950_v11, 4 }
 0x15d   : > { %1002 = vst.msk [vmem:[#allocation2 + $0x260] sm:$0xf] %vm368_vm8, %v950_v11 }
 0x15e   : > { %1706 = vmatpush.bf16.msra.mxu1 %v2621_v38  ;;  %v986_v44 = vsel %vm334_vm1, %v969_v13, %v970_v39  ;;  %v978_v42 = vsel %vm334_vm1, %v964_v14, %v965_v35  ;;  %v2727_v14 = vld [vmem:[#allocation2 + $0x38] sm:$0xf0]  ;;  %v2481_v38 = vor.u32 %v2746_v43, %v2480_v28  ;;  %v2408_v33 = vld [vmem:[#allocation2 + $0x20] sm:$0xf] }
 0x15f   : > { %v987_v55 = vsel %vm972_vm3, %v3645_v58, %v986_v44  ;;  %v979_v6 = vsel %vm972_vm3, %v3712_v7, %v978_v42  ;;  %v2400_v13 = vld [vmem:[#allocation2 + $0x18] sm:$0xf]  ;;  %v2741_v7 = vld [vmem:[#allocation2 + $0xac] sm:$0xf]  ;;  %v2723_v3 = vld [vmem:[#allocation2 + $0x1c] sm:$0xf]  ;;  %v2409_v39 = vor.u32 %v2728_v27, %v2408_v33 }
 0x160   : > { %1006 = vst [vmem:[#allocation2 + $0x27c] sm:$0xff] %v987_v55  ;;  %v2736_v48 = vld [vmem:[#allocation2 + $0x80] sm:$0xf0]  ;;  %v2401_v58 = vor.u32 %v2727_v14, %v2400_v13  ;;  %v2477_v36 = vor.u32 %v2741_v7, %v2474_v47  ;;  %v2438_v12 = vld [vmem:[#allocation2 + $0x84] sm:$0xf0]  ;;  %v2405_v5 = vor.u32 %v2723_v3, %v2402_v62 }
 0x161   : > { %1001 = vst [vmem:[#allocation2 + $0x258] sm:$0xff] %v979_v6  ;;  %v2437_v0 = vor.u32 %v2736_v48, %v2436_v50  ;;  %v2441_v1 = vor.u32 %v2732_v37, %v2438_v12  ;;  %v2737_v34 = vld [vmem:[#allocation2 + $0x88] sm:$0xf0] }
 0x162   : > { %1707 = vmatpush.bf16.msra.mxu1 %v2585_v61  ;;  %v2445_v11 = vor.u32 %v2737_v34, %v2444_v30 }
 0x163   : > { %1685 = vmatpush.bf16.msrb.mxu3 %v2437_v0  ;;  %v2800_v25 = vld [vmem:[#allocation2 + $0x280] sm:$0xf0] }
 0x164   : > { %v2696_v52 = vld [vmem:[#allocation2 + $0x260] sm:$0xf] }
 0x165   : > { %2703 = vmatmul.msk.bf16.vlgmr.msrb.gmra.mxu1 %vm1519_vm6, %v3483_v17  ;;  %v2697_v46 = vor.u32 %v2800_v25, %v2696_v52 }
 0x166   : > { %1708 = vmatpush.bf16.msra.mxu1 %v2549_v16 }
 0x167   : > { %1686 = vmatpush.bf16.msrb.mxu3 %v2401_v58  ;;  %v2799_v57 = vld [vmem:[#allocation2 + $0x278] sm:$0xf0]  ;;  %v2690_v22 = vld [vmem:[#allocation2 + $0x27c] sm:$0xf0] }
 0x168   : > { %v2688_v9 = vld [vmem:[#allocation2 + $0x258] sm:$0xf]  ;;  %v2795_v15 = vld [vmem:[#allocation2 + $0x25c] sm:$0xf] }
 0x169   : > { %v2689_v41 = vor.u32 %v2799_v57, %v2688_v9  ;;  %v2693_v26 = vor.u32 %v2795_v15, %v2690_v22 }
 0x16a   : > { %1709 = vmatpush.bf16.msra.mxu1 %v2513_v56  ;;  %1687 = vmatmul.bf16.vlgmr.msrb.gmra.mxu3 %v3558_v51 }
 0x16b   : > { %1751 = vmatpush.bf16.msra.mxu3 %v2697_v46  ;;  %1699 = vmatpush.bf16.msra.mxu2 %v2689_v41 }
 0x16c   : > { %1725 = vmatpush.bf16.msrb.mxu0 %v2693_v26 }
 0x16e   : > { %1710 = vmatpush.bf16.msra.mxu1 %v2477_v36  ;;  %2704 = vmatmul.msk.bf16.vlgmr.msra.gmra.mxu2 %vm1519_vm6, %v3483_v17 }
 0x16f   : > { %1731 = vmatpush.bf16.msrb.mxu2 %v2661_v8  ;;  %2705 = vmatmul.msk.bf16.vlgmr.msrb.gmra.mxu0 %vm1519_vm6, %v3483_v17 }
 0x172   : > { %1711 = vmatpush.bf16.msra.mxu1 %v2441_v1 }
 0x173   : > { %1732 = vmatpush.bf16.msrb.mxu2 %v2625_v45 }
 0x176   : > { %1712 = vmatpush.bf16.msra.mxu1 %v2405_v5  ;;  %v1545_v31 = vpop.f32.mrf.mxu1 }
 0x177   : > { %1733 = vmatpush.bf16.msrb.mxu2 %v2589_v4 }
 0x179   : > { %1713 = vmatmul.bf16.vlgmr.msra.gmra.mxu1 %v3558_v51 }
 0x17a   : > { %2706 = vmatmul.msk.bf16.vlgmr.msra.gmra.mxu3 %vm1519_vm6, %v3483_v17 }
 0x17b   : > { %1734 = vmatpush.bf16.msrb.mxu2 %v2553_v60 }
 0x17c   : > { %v1571_v2 = vpop.f32.mrf.mxu3 }
 0x17e   : > { %v1547_v20 = vpop.f32.mrf.mxu1 }
 0x17f   : > { %1735 = vmatpush.bf16.msrb.mxu2 %v2517_v53 }
 0x183   : > { %1736 = vmatpush.bf16.msrb.mxu2 %v2481_v38 }
 0x184   : > { %v1573_v35 = vpop.f32.mrf.mxu3 }
 0x187   : > { %1737 = vmatpush.bf16.msrb.mxu2 %v2445_v11 }
 0x18b   : > { %1738 = vmatpush.bf16.msrb.mxu2 %v2409_v39 }
 0x18e   : > { %1739 = vmatmul.bf16.vlgmr.msrb.gmra.mxu2 %v3558_v51 }
 0x193   : > { %v1532_v17 = vpop.f32.mrf.mxu0 }
 0x194   : > { %v1546_v42 = vadd.f32 %v1545_v31, %v1532_v17 }
 0x196   : > { %v1783_v4 = vsub.f32 0.0, %v1546_v42 }
 0x198   : > { %v1792_v21 = vmul.f32 1.442695, %v1783_v4 }
 0x199   : > { %v1558_v61 = vpop.f32.mrf.mxu2 }
 0x19a   : > { %v3789_v44 = vadd.f32 %v1571_v2, %v1558_v61  ;;  %2850 = vpow2.f32 %v1792_v21 }
 0x19b   : > { %v1534_v16 = vpop.f32.mrf.mxu0 }
 0x19c   : > { %v1765_v55 = vrot.slane %v3789_v44, 4  ;;  %v1784_v30 = vsub.f32 0.0, %v3789_v44 }
 0x19e   : > { %v1770_v6 = vsel %vm334_vm1, %v1546_v42, %v1765_v55  ;;  %v1794_v27 = vmul.f32 1.442695, %v1784_v30  ;;  %v3822_v30 = vld [vmem:[%s3072_s13 + $0x8] sm:$0xff] }
 0x19f   : > { %1778 = vst [vmem:[%s3795_s14] sm:$0xff] %v1770_v6 }
 0x1a0   : > { %v2851_v35 = vpop.eup %2850 }
 0x1a1   : > { %v1560_v51 = vpop.f32.mrf.mxu2  ;;  %v1597_v50 = vpop.f32.mrf.mxu3  ;;  %v1810_v16 = vadd.f32 1.0, %v2851_v35 }
 0x1a3   : > { %v1623_v48 = vpop.f32.mrf.mxu0 }
 0x1a9   : > { %v1599_v0 = vpop.f32.mrf.mxu3 }
 0x1ab   : > { %v1625_v54 = vpop.f32.mrf.mxu0 }
 0x1b3   : > { %v1584_v13 = vpop.f32.mrf.mxu1 }
 0x1b4   : > { %v1598_v14 = vadd.f32 %v1597_v50, %v1584_v13 }
 0x1b6   : > { %v1785_v2 = vsub.f32 0.0, %v1598_v14 }
 0x1b8   : > { %v1796_v39 = vmul.f32 1.442695, %v1785_v2  ;;  %v1848_v2 = vld [vmem:[%s3072_s13 + $0x40] sm:$0x11] }
 0x1bb   : > { %v1586_v29 = vpop.f32.mrf.mxu1 }
 0x1c1   : > { %v1610_v25 = vpop.f32.mrf.mxu3 }
 0x1c2   : > { %v1624_v56 = vadd.f32 %v1623_v48, %v1610_v25 }
 0x1c4   : > { %v1766_v52 = vrot.slane %v1624_v56, 4  ;;  %v1786_v60 = vsub.f32 0.0, %v1624_v56 }
 0x1c6   : > { %v1771_v58 = vsel %vm334_vm1, %v1598_v14, %v1766_v52  ;;  %v1798_v28 = vmul.f32 1.442695, %v1786_v60 }
 0x1c7   : > { %1779 = vst [vmem:[%s3795_s14 + $0x8] sm:$0xff] %v1771_v58 }
 0x1c8   : > { %2852 = vpow2.f32 %v1798_v28 }
 0x1c9   : > { %v1612_v46 = vpop.f32.mrf.mxu3 }
 0x1cc   : > { %v1662_v7 = vpop.f32.mrf.mxu0 }
 0x1ce   : > { %v2853_v61 = vpop.eup %2852 }
 0x1cf   : > { %v1813_v50 = vadd.f32 1.0, %v2853_v61  ;;  %v1954_v61 = vunpack.c.l.b16 %v3822_v30 }
 0x1d1   : > { %v1636_v47 = vpop.f32.mrf.mxu2 }
 0x1d2   : > { %v1649_v23 = vpop.f32.mrf.mxu1 }
 0x1d3   : > { %v1650_v15 = vadd.f32 %v1649_v23, %v1636_v47 }
 0x1d4   : > { %v1664_v57 = vpop.f32.mrf.mxu0 }
 0x1d5   : > { %v1787_v63 = vsub.f32 0.0, %v1650_v15 }
 0x1d7   : > { %v1800_v34 = vmul.f32 1.442695, %v1787_v63 }
 0x1d9   : > { %v1638_v22 = vpop.f32.mrf.mxu2  ;;  %2854 = vpow2.f32 %v1800_v34 }
 0x1da   : > { %v1651_v10 = vpop.f32.mrf.mxu1 }
 0x1df   : > { %v2855_v42 = vpop.eup %2854 }
 0x1e0   : > { %v1814_v0 = vadd.f32 1.0, %v2855_v42  ;;  %v1854_v42 = vunpack.c.l.bf16 %v1848_v2 }
 0x1e2   : > { %v1675_v9 = vpop.f32.mrf.mxu1 }
 0x1e3   : > { %v1676_v36 = vadd.f32 %v1675_v9, %v1662_v7 }
 0x1e5   : > { %v1767_v41 = vrot.slane %v1676_v36, 4  ;;  %v1788_v31 = vsub.f32 0.0, %v1676_v36 }
 0x1e7   : > { %v1772_v26 = vsel %vm334_vm1, %v1650_v15, %v1767_v41  ;;  %v1802_v20 = vmul.f32 1.442695, %v1788_v31 }
 0x1e8   : > { %1780 = vst [vmem:[%s3795_s14 + $0x10] sm:$0xff] %v1772_v26 }
 0x1ea   : > { %v1677_v12 = vpop.f32.mrf.mxu1 }
 0x1ec   : > { %v1727_v8 = vpop.f32.mrf.mxu0 }
 0x1ed   : > { %v1688_v37 = vpop.f32.mrf.mxu3 }
 0x1f1   : > { %v1701_v49 = vpop.f32.mrf.mxu2 }
 0x1f2   : > { %v1702_v45 = vadd.f32 %v1701_v49, %v1688_v37 }
 0x1f4   : > { %v1729_v3 = vpop.f32.mrf.mxu0  ;;  %v1789_v43 = vsub.f32 0.0, %v1702_v45 }
 0x1f5   : > { %v1690_v40 = vpop.f32.mrf.mxu3 }
 0x1f6   : > { %v1714_v19 = vpop.f32.mrf.mxu1  ;;  %v1804_v33 = vmul.f32 1.442695, %v1789_v43 }
 0x1f7   : > { %v1728_v1 = vadd.f32 %v1727_v8, %v1714_v19 }
 0x1f9   : > { %v1768_v62 = vrot.slane %v1728_v1, 4  ;;  %v1703_v5 = vpop.f32.mrf.mxu2  ;;  %v1790_v53 = vsub.f32 0.0, %v1728_v1 }
 0x1fb   : > { %v1773_v59 = vsel %vm334_vm1, %v1702_v45, %v1768_v62  ;;  %v1806_v11 = vmul.f32 1.442695, %v1790_v53 }
 0x1fc   : > { %1781 = vst [vmem:[%s3795_s14 + $0x18] sm:$0xff] %v1773_v59 }
 0x1fd   : > { %v1753_v18 = vpop.f32.mrf.mxu3  ;;  %2856 = vpow2.f32 %v1806_v11 }
 0x1fe   : > { %v1716_v32 = vpop.f32.mrf.mxu1  ;;  %2858 = vpow2.f32 %v1802_v20 }
 0x1ff   : > { %2860 = vpow2.f32 %v1804_v33 }
 0x200   : > { %2862 = vpow2.f32 %v1794_v27 }
 0x201   : > { %2864 = vpow2.f32 %v1796_v39 }
 0x202   : > { %2866 = vrcp.f32 %v1810_v16 }
 0x203   : > { %v2857_v55 = vpop.eup %2856 }
 0x204   : > { %v2859_v51 = vpop.eup %2858  ;;  %v1817_v29 = vadd.f32 1.0, %v2857_v55  ;;  %v1849_v55 = vld [vmem:[%s3072_s13 + $0x48] sm:$0x11] }
 0x205   : > { %v1755_v38 = vpop.f32.mrf.mxu3  ;;  %v2861_v48 = vpop.eup %2860  ;;  %v1815_v14 = vadd.f32 1.0, %v2859_v51 }
 0x206   : > { %v2863_v13 = vpop.eup %2862  ;;  %v1816_v56 = vadd.f32 1.0, %v2861_v48  ;;  %v1847_v38 = vld [vmem:[%s3072_s13 + $0x38] sm:$0x11]  ;;  %v1855_v48 = vunpack.c.h.bf16 %v1848_v2 }
 0x207   : > { %v2865_v25 = vpop.eup %2864  ;;  %v1811_v58 = vadd.f32 1.0, %v2863_v13  ;;  %v1852_v35 = vunpack.c.l.bf16 %v1847_v38 }
 0x208   : > { %v1812_v46 = vadd.f32 1.0, %v2865_v25  ;;  %v2867_v7 = vpop.eup %2866 }
 0x209   : > { %v1828_v8 = vsel %vm334_vm1, %v2867_v7, -inf  ;;  %v1888_v13 = vperm.slane %v1852_v35, 0 }
 0x211   : > { %v1740_v17 = vpop.f32.mrf.mxu2 }
 0x212   : > { %v1754_v44 = vadd.f32 %v1753_v18, %v1740_v17 }
 0x214   : > { %1782 = vst.msk [vmem:[%s3795_s14 + $0x20] sm:$0xf] %vm368_vm8, %v1754_v44  ;;  %v1791_v6 = vsub.f32 0.0, %v1754_v44  ;;  %v1853_v44 = vunpack.c.h.bf16 %v1847_v38  ;;  %s267_s14 = scalar_lea.vmem [#allocation3], %s2369_s28 }
 0x215   : > { %s2266_s9 = sshll.u32 %s267_s14, 4  ;;  %s2267_s9 = int_to_ptr.vmem [resolvable:$true] %s2266_s9 }
 0x216   : > { %v1808_v54 = vmul.f32 1.442695, %v1791_v6  ;;  %v1889_v25 = vperm.slane %v1853_v44, 0 }
 0x218   : > { %2868 = vpow2.f32 %v1808_v54 }
 0x219   : > { %2870 = vrcp.f32 %v1813_v50  ;;  %v1742_v52 = vpop.f32.mrf.mxu2  ;;  %v1963_v50 = vpack.c.b16 %v1954_v61, %v1954_v61 }
 0x21a   : > { %2872 = vrcp.f32 %v1814_v0  ;;  %v1890_v52 = vperm.slane %v1854_v42, 0  ;;  %v1936_v42 = vld [vmem:[%s3072_s13 + $0x10] sm:$0xff] }
 0x21b   : > { %2874 = vrcp.f32 %v1817_v29  ;;  %1993 = vmatpush.bf16.xpose.msra.mxu0 %v1963_v50  ;;  %v1856_v29 = vunpack.c.l.bf16 %v1849_v55 }
 0x21c   : > { %2876 = vrcp.f32 %v1815_v14  ;;  %v1850_v14 = vld [vmem:[%s3072_s13 + $0x50] sm:$0x11] }
 0x21d   : > { %2878 = vrcp.f32 %v1816_v56 }
 0x21e   : > { %v2869_v47 = vpop.eup %2868  ;;  %2880 = vrcp.f32 %v1811_v58 }
 0x21f   : > { %v2871_v23 = vpop.eup %2870  ;;  %2882 = vrcp.f32 %v1812_v46  ;;  %v1818_v57 = vadd.f32 1.0, %v2869_v47  ;;  %v1857_v46 = vunpack.c.h.bf16 %v1849_v55  ;;  %v1937_v55 = vld [vmem:[%s3072_s13 + $0x18] sm:$0xff] }
 0x220   : > { %v2873_v22 = vpop.eup %2872  ;;  %v1831_v37 = vsel %vm334_vm1, %v2871_v23, -inf }
 0x221   : > { %v3808_v10 = vpop.eup %2874  ;;  %2884 = vrcp.f32 %v1818_v57  ;;  %v1832_v41 = vsel %vm334_vm1, %v2873_v22, -inf }
 0x222   : > { %v2877_v9 = vpop.eup %2876  ;;  %v1838_v26 = vsel %vm334_vm1, %v3808_v10, -inf  ;;  %v1833_v3 = vmax.f32 %v1828_v8, %v1832_v41  ;;  %v1851_v41 = vld [vmem:[%s3072_s13 + $0x58] sm:$0x1] }
 0x223   : > { %v2879_v36 = vpop.eup %2878  ;;  %v1834_v49 = vsel %vm334_vm1, %v2877_v9, -inf  ;;  %v1839_v45 = vmax.f32 %v1831_v37, %v1838_v26  ;;  %v1859_v37 = vunpack.c.h.bf16 %v1850_v14 }
 0x224   : > { %v2881_v15 = vpop.eup %2880  ;;  %v1836_v19 = vsel %vm334_vm1, %v2879_v36, -inf }
 0x225   : > { %v2883_v12 = vpop.eup %2882  ;;  %v1829_v62 = vsel %vm334_vm1, %v2881_v15, -inf }
 0x226   : > { %v1830_v40 = vsel %vm334_vm1, %v2883_v12, -inf  ;;  %v1835_v5 = vmax.f32 %v1829_v62, %v1834_v49  ;;  %v1893_v49 = vperm.slane %v1857_v46, 0  ;;  %v1860_v62 = vunpack.c.l.bf16 %v1851_v41 }
 0x227   : > { %v2885_v1 = vpop.eup %2884  ;;  %v1837_v32 = vmax.f32 %v1830_v40, %v1836_v19 }
 0x228   : > { %v1840_v59 = vsel %vm368_vm8, %v2885_v1, -inf }
 0x229   : > { %v1841_v18 = vmax.f32 %v1833_v3, %v1840_v59  ;;  %v1843_v60 = vmax.f32 %v1837_v32, %v1839_v45 }
 0x22b   : > { %v1842_v4 = vmax.f32 %v1841_v18, %v1835_v5 }
 0x22d   : > { %v1844_v63 = vmax.f32 %v1842_v4, %v1843_v60  ;;  %v1895_v4 = vperm.slane %v1859_v37, 0 }
 0x22f   : > { %1845 = vmax.xlane.f32.xlu2 %v1844_v63 }
 0x2a2   : > { %v1846_v21 = vpop.xlane.xlu2 %1845 }
 0x2a3   : > { %v1861_v53 = vsub.f32 %v2867_v7, %v1846_v21  ;;  %v1862_v31 = vsub.f32 %v2881_v15, %v1846_v21  ;;  %v1863_v28 = vsub.f32 %v2883_v12, %v1846_v21  ;;  %v1864_v43 = vsub.f32 %v2871_v23, %v1846_v21 }
 0x2a4   : > { %v1865_v34 = vsub.f32 %v2873_v22, %v1846_v21  ;;  %v1866_v11 = vsub.f32 %v2877_v9, %v1846_v21  ;;  %v1867_v17 = vsub.f32 %v2879_v36, %v1846_v21  ;;  %v1868_v6 = vsub.f32 %v3808_v10, %v1846_v21 }
 0x2a5   : > { %v1870_v20 = vmul.f32 1.442695, %v1861_v53  ;;  %v1872_v33 = vmul.f32 1.442695, %v1862_v31  ;;  %v1874_v27 = vmul.f32 1.442695, %v1863_v28  ;;  %v1869_v0 = vsub.f32 %v2885_v1, %v1846_v21 }
 0x2a6   : > { %v1876_v39 = vmul.f32 1.442695, %v1864_v43  ;;  %v1878_v16 = vmul.f32 1.442695, %v1865_v34  ;;  %v1880_v51 = vmul.f32 1.442695, %v1866_v11  ;;  %v1858_v10 = vunpack.c.l.bf16 %v1850_v14 }
 0x2a7   : > { %2886 = vpow2.f32 %v1870_v20  ;;  %v1882_v54 = vmul.f32 1.442695, %v1867_v17  ;;  %v1884_v56 = vmul.f32 1.442695, %v1868_v6  ;;  %v1891_v7 = vperm.slane %v1855_v48, 0 }
 0x2a8   : > { %2888 = vpow2.f32 %v1872_v33  ;;  %v1886_v23 = vmul.f32 1.442695, %v1869_v0  ;;  %v1892_v9 = vperm.slane %v1856_v29, 0  ;;  %v1894_v40 = vperm.slane %v1858_v10, 0 }
 0x2a9   : > { %2890 = vpow2.f32 %v1874_v27  ;;  %v1896_v31 = vperm.slane %v1860_v62, 0  ;;  %v1956_v6 = vunpack.c.l.b16 %v1936_v42  ;;  %v1959_v29 = vunpack.c.h.b16 %v1937_v55 }
 0x2aa   : > { %2892 = vpow2.f32 %v1876_v39 }
 0x2ab   : > { %2894 = vpow2.f32 %v1878_v16  ;;  %v1955_v16 = vunpack.c.h.b16 %v3822_v30  ;;  %v1965_v48 = vpack.c.b16 %v1956_v6, %v1956_v6 }
 0x2ac   : > { %2896 = vpow2.f32 %v1880_v51  ;;  %v1958_v51 = vunpack.c.l.b16 %v1937_v55 }
 0x2ad   : > { %v2887_v58 = vpop.eup %2886  ;;  %2898 = vpow2.f32 %v1882_v54  ;;  %v1964_v50 = vpack.c.b16 %v1955_v16, %v1955_v16  ;;  %2019 = vmatpush.bf16.xpose.msrb.mxu3 %v1965_v48  ;;  %v1957_v54 = vunpack.c.h.b16 %v1936_v42  ;;  %v2849_v48 = vld [vmem:[%s3924_s3] ss:$0 sm:$0xff] }
 0x2ae   : > { %v2889_v47 = vpop.eup %2888  ;;  %v3829_v57 = vmul.f32 %v2887_v58, %v1888_v13  ;;  %2900 = vpow2.f32 %v1884_v56  ;;  %v1967_v0 = vpack.c.b16 %v1958_v51, %v1958_v51  ;;  %v1960_v13 = vunpack.c.l.b16 %v3642_v24 }
 0x2af   : > { %v2891_v22 = vpop.eup %2890  ;;  %v3831_v36 = vmul.f32 %v2889_v47, %v1889_v25  ;;  %2902 = vpow2.f32 %v1886_v23  ;;  %2006 = vmatpush.bf16.xpose.msrb.mxu1 %v1964_v50  ;;  %v1939_v25 = vld [vmem:[%s3072_s13 + $0x28] sm:$0xf]  ;;  %v1966_v56 = vpack.c.b16 %v1957_v54, %v1957_v54  ;;  %v1968_v58 = vpack.c.b16 %v1959_v29, %v1959_v29  ;;  %v2910_v47 = vld [vmem:[#allocation2 + $0x138] sm:$0xff]  ;;  %s2268_s13 = sshll.u32 %s2264_s12, 4  ;;  %s2269_s13 = int_to_ptr.hbm [resolvable:$true] %s2268_s13 }
 0x2b0   : > { %v2893_v15 = vpop.eup %2892  ;;  %v3834_v26 = vmul.f32 %v2891_v22, %v1890_v52  ;;  %v1906_v12 = vsel %vm334_vm1, %v3829_v57, 0.0  ;;  %2045 = vmatpush.bf16.xpose.msra.mxu2 %v1967_v0  ;;  %v1962_v14 = vunpack.c.l.b16 %v1939_v25  ;;  %v1969_v52 = vpack.c.b16 %v1960_v13, %v1960_v13  ;;  %s2925_s16 = sshra.s32 %s2269_s13, 4  ;;  %s2926_s16 = int_to_ptr.hbm [resolvable:$true] %s2925_s16 }
 0x2b1   : > { %v2895_v8 = vpop.eup %2894  ;;  %v3838_v19 = vmul.f32 %v2893_v15, %v1891_v7  ;;  %v1907_v1 = vsel %vm334_vm1, %v3831_v36, 0.0  ;;  %2032 = vmatpush.bf16.xpose.msrb.mxu0 %v1966_v56  ;;  %v1961_v23 = vunpack.c.h.b16 %v2910_v47  ;;  %s2927_s17 = scalar_lea.hbm %s2926_s16, 8  ;;  %p2932_p0 = scmp.lt.s32.totalorder %s2926_s16, %s3927_s6 }
 0x2b2   : > { %v2897_v3 = vpop.eup %2896  ;;  %v1908_v45 = vadd.f32 %v1907_v1, %v1906_v12  ;;  %v1901_v59 = vmul.f32 %v2895_v8, %v1892_v9  ;;  %v1909_v5 = vsel %vm334_vm1, %v3834_v26, 0.0  ;;  %v1971_v46 = vpack.c.b16 %v1962_v14, %v1962_v14  ;;  %p2928_p11 = scmp.ne.s32.totalorder %s2926_s16, %s2927_s17  ;;  %p2933_p1 = scmp.lt.s32.totalorder %s2931_s19, %s2927_s17 }
 0x2b3   : > { %v2899_v32 = vpop.eup %2898  ;;  %v3844_v60 = vmul.f32 %v2897_v3, %v1893_v49  ;;  %v1911_v63 = vsel %vm334_vm1, %v3838_v19, 0.0  ;;  %v1970_v41 = vpack.c.b16 %v1961_v23, %v1961_v23 }
 0x2b4   : > { %v1910_v18 = vadd.f32 %v1909_v5, %v1908_v45  ;;  %v2901_v21 = vpop.eup %2900  ;;  %v1903_v28 = vmul.f32 %v2899_v32, %v1894_v40  ;;  %v1913_v43 = vsel %vm334_vm1, %v1901_v59, 0.0  ;;  %v1984_v30 = vsel %vm1519_vm6, %v1971_v46, 0  ;;  %v2103_v32 = vld [vmem:[%s3923_s2] sm:$0xff]  ;;  %p2929_p12 = pnand %p2928_p11, %p3054_p5  ;;  %p2934_p2 = por %p2933_p1, %p2932_p0 }
 0x2b5   : > { %v2903_v38 = vpop.eup %2902  ;;  %v3849_v2 = vmul.f32 %v2901_v21, %v1895_v4  ;;  %v1915_v11 = vsel %vm334_vm1, %v3844_v60, 0.0  ;;  %2071 = vmatpush.bf16.xpose.msra.mxu3 %v1969_v52 }
 0x2b6   : > { %v1912_v53 = vadd.f32 %v1911_v63, %v1910_v18  ;;  %v1905_v33 = vmul.f32 %v2903_v38, %v1896_v31  ;;  %v1917_v27 = vsel %vm334_vm1, %v1903_v28, 0.0  ;;  %v2139_v31 = vld [vmem:[%s3925_s4] sm:$0xff]  ;;  %p2930_p13 = pneg %p2929_p12 }
 0x2b7   : > { %v1919_v35 = vsel %vm334_vm1, %v3849_v2, 0.0  ;;  %2058 = vmatpush.bf16.xpose.msra.mxu1 %v1968_v58 }
 0x2b8   : > { %v1914_v34 = vadd.f32 %v1913_v43, %v1912_v53  ;;  %v1921_v61 = vsel %vm368_vm8, %v1905_v33, 0.0  ;;  %2097 = vmatpush.bf16.xpose.msrb.mxu2 %v1984_v30  ;;  %p2935_p3 = pnand %p2934_p2, %p2930_p13 }
 0x2ba   : > { %v1916_v20 = vadd.f32 %v1915_v11, %v1914_v34 }
 0x2bc   : > { %v1918_v39 = vadd.f32 %v1917_v27, %v1916_v20 }
 0x2be   : > { %v1920_v17 = vadd.f32 %v1919_v35, %v1918_v39 }
 0x2c0   : > { %v1922_v44 = vadd.f32 %v1921_v61, %v1920_v17 }
 0x2c2   : > { %1923 = vadd.xlane.f32.xlu0 %v1922_v44 }
 0x335   : > { %v1924_v7 = vpop.xlane.xlu0 %1923 }
 0x336   : > { %2904 = vrcp.f32 %v1924_v7 }
 0x33c   : > { %v2905_v22 = vpop.eup %2904 }
 0x33d   : > { %v1926_v24 = vmul.f32 %v2905_v22, %v3829_v57  ;;  %v1927_v10 = vmul.f32 %v2905_v22, %v3831_v36  ;;  %v1928_v9 = vmul.f32 %v2905_v22, %v3834_v26  ;;  %v1930_v15 = vmul.f32 %v2905_v22, %v1901_v59 }
 0x33e   : > { %v1929_v1 = vmul.f32 %v2905_v22, %v3838_v19  ;;  %v1931_v3 = vmul.f32 %v2905_v22, %v3844_v60  ;;  %v1932_v57 = vmul.f32 %v2905_v22, %v1903_v28  ;;  %v1934_v45 = vmul.f32 %v2905_v22, %v1905_v33  ;;  %v2104_v19 = vld [vmem:[%s3923_s2 + $0x8] sm:$0xff] }
 0x33f   : > { %v1940_v12 = vpack.c.bf16 %v1926_v24, %v1926_v24  ;;  %v1941_v8 = vpack.c.bf16 %v1927_v10, %v1927_v10  ;;  %v1942_v37 = vpack.c.bf16 %v1928_v9, %v1928_v9  ;;  %v1944_v49 = vpack.c.bf16 %v1930_v15, %v1930_v15 }
 0x340   : > { %v1943_v36 = vpack.c.bf16 %v1929_v1, %v1929_v1  ;;  %v1945_v62 = vpack.c.bf16 %v1931_v3, %v1931_v3  ;;  %v1946_v26 = vpack.c.bf16 %v1932_v57, %v1932_v57  ;;  %v1948_v40 = vpack.c.bf16 %v1934_v45, %v1934_v45 }
 0x341   : > { %1994 = vmatmul.bf16.vlgmr.msra.gmra.mxu0 %v1940_v12  ;;  %2007 = vmatmul.bf16.vlgmr.msrb.gmra.mxu1 %v1941_v8  ;;  %v1933_v59 = vmul.f32 %v2905_v22, %v3849_v2 }
 0x342   : > { %2020 = vmatmul.bf16.vlgmr.msrb.gmra.mxu3 %v1942_v37  ;;  %2046 = vmatmul.bf16.vlgmr.msra.gmra.mxu2 %v1944_v49 }
 0x343   : > { %2084 = vmatpush.bf16.xpose.msra.mxu0 %v1970_v41  ;;  %v1947_v5 = vpack.c.bf16 %v1933_v59, %v1933_v59  ;;  %2708 = vmatpush.xpose.msk.msrb.mxu1 %vm2109_vm9, %v2104_v19 }
 0x344   : > { %2711 = vmatpush.xpose.msk.msrb.mxu3 %vm1519_vm6, %v2139_v31 }
 0x347   : > { %2709 = vmatpush.xpose.msk.msrb.mxu1 %vm2109_vm9, %v2103_v32 }
 0x351   : > { %2033 = vmatmul.bf16.vlgmr.msrb.gmra.mxu0 %v1943_v36  ;;  %2059 = vmatmul.bf16.vlgmr.msra.gmra.mxu1 %v1945_v62 }
 0x352   : > { %2072 = vmatmul.bf16.vlgmr.msra.gmra.mxu3 %v1946_v26  ;;  %2707 = vmatmul.msk.bf16.vlgmr.msrb.gmra.mxu2 %vm1519_vm6, %v1948_v40 }
 0x361   : > { %2085 = vmatmul.bf16.vlgmr.msra.gmra.mxu0 %v1947_v5 }
 0x3be   : > { %v1995_v18 = vpop.f32.mrf.mxu0  ;;  %v2008_v4 = vpop.f32.mrf.mxu1 }
 0x3bf   : > { %v2009_v28 = vadd.f32 %v2008_v4, %v1995_v18 }
 0x3c5   : > { %v2021_v60 = vpop.f32.mrf.mxu3  ;;  %v2047_v63 = vpop.f32.mrf.mxu2 }
 0x3c6   : > { %v1997_v21 = vpop.f32.mrf.mxu0  ;;  %v2010_v53 = vpop.f32.mrf.mxu1  ;;  %v2022_v11 = vadd.f32 %v2021_v60, %v2009_v28 }
 0x3cd   : > { %v2023_v43 = vpop.f32.mrf.mxu3  ;;  %v2049_v38 = vpop.f32.mrf.mxu2 }
 0x3ce   : > { %v2034_v34 = vpop.f32.mrf.mxu0  ;;  %v2060_v2 = vpop.f32.mrf.mxu1 }
 0x3cf   : > { %v2035_v20 = vadd.f32 %v2034_v34, %v2022_v11 }
 0x3d1   : > { %v2048_v33 = vadd.f32 %v2047_v63, %v2035_v20 }
 0x3d3   : > { %v2061_v61 = vadd.f32 %v2060_v2, %v2048_v33 }
 0x3d5   : > { %v2073_v27 = vpop.f32.mrf.mxu3  ;;  %v2099_v39 = vpop.f32.mrf.mxu2 }
 0x3d6   : > { %v2036_v35 = vpop.f32.mrf.mxu0  ;;  %v2062_v17 = vpop.f32.mrf.mxu1  ;;  %v2074_v44 = vadd.f32 %v2073_v27, %v2061_v61 }
 0x3dd   : > { %v2075_v42 = vpop.f32.mrf.mxu3  ;;  %v2101_v16 = vpop.f32.mrf.mxu2 }
 0x3de   : > { %v2086_v55 = vpop.f32.mrf.mxu0 }
 0x3df   : > { %v2087_v6 = vadd.f32 %v2086_v55, %v2074_v44 }
 0x3e1   : > { %v2100_v51 = vadd.f32 %v2099_v39, %v2087_v6 }
 0x3e3   : > { %2710 = vmatmul.msk.f32.vlgmr.msrb.gmra.mxu1 %vm2109_vm9, %v2100_v51 }
 0x3e6   : > { %v2088_v50 = vpop.f32.mrf.mxu0 }
 0x460   : > { %v2136_v0 = vpop.f32.mrf.mxu1 }
 0x461   : > { %v2137_v54 = vadd.f32 %v2849_v48, %v2136_v0 }
 0x463   : > { %2712 = vmatmul.msk.f32.vlgmr.msrb.gmra.mxu3 %vm1519_vm6, %v2137_v54  ;;  %2713 = vmatpush.msk.msra.mxu1 %vm334_vm1, %v2137_v54 }
 0x4e6   : > { %v2163_v13 = vpop.f32.mrf.mxu3 }
 0x4e7   : > { %v2167_v29 = vsel %vm2166_vm10, %v2163_v13, -inf }
 0x4e8   : > { %v2168_v25 = vrot.slane %v2167_v29, 4 }
 0x4ea   : > { %v2169_v14 = vmax.f32 %v2167_v29, %v2168_v25 }
 0x4ec   : > { %v2170_v56 = vrot.slane %v2169_v14, 2 }
 0x4ee   : > { %v2171_v52 = vmax.f32 %v2169_v14, %v2170_v56 }
 0x4f0   : > { %v2172_v58 = vrot.slane %v2171_v52, 1 }
 0x4f2   : > { %v2173_v46 = vmax.f32 %v2171_v52, %v2172_v58 }
 0x4f4   : > { %v2174_v30 = vsub.f32 %v2163_v13, %v2173_v46 }
 0x4f6   : > { %v2175_v7 = vmul.f32 1.442695, %v2174_v30 }
 0x4f8   : > { %2906 = vpow2.f32 %v2175_v7 }
 0x4fe   : > { %v2907_v47 = vpop.eup %2906 }
 0x4ff   : > { %v2177_v23 = vsel %vm2166_vm10, %v2907_v47, 0.0 }
 0x500   : > { %v2178_v22 = vrot.slane %v2177_v23, 4 }
 0x502   : > { %v2179_v24 = vadd.f32 %v2178_v22, %v2177_v23 }
 0x504   : > { %v2180_v10 = vrot.slane %v2179_v24, 2 }
 0x506   : > { %v2181_v9 = vadd.f32 %v2180_v10, %v2179_v24 }
 0x508   : > { %v2182_v15 = vrot.slane %v2181_v9, 1 }
 0x50a   : > { %v2183_v41 = vadd.f32 %v2182_v15, %v2181_v9 }
 0x50c   : > { %2908 = vrcp.f32 %v2183_v41 }
 0x512   : > { %v2909_v12 = vpop.eup %2908 }
 0x513   : > { %v2185_v8 = vmul.f32 %v2909_v12, %v2907_v47 }
 0x515   : > { %2186 = vxpose.xlu1.b32.start.end [1/1] (short) (narrow) %v2185_v8, 8 }
 0x5b9   : > { %v2202_v37 = vpop.trf.xlu1 }
 0x5ba   : > { %2714 = vmatmul.msk.f32.vlgmr.msra.gmra.mxu1 %vm2218_vm11, %v2202_v37 }
 0x637   : > { %v2241_v49 = vpop.f32.mrf.mxu1 }
 0x638   : > { %2244 = vst.msk [vmem:[%s267_s14] sm:$0xff] %vm1519_vm6, %v2241_v49 }
 0x639   : > { %2938 = shalt.err (!%p2935_p3)
}
 0x63a   : > { %2803 = dma.vmem_to_hbm [thread:$0]  (%p3054_p5), %s2267_s9, 128, %s2269_s13, %s2251_s15  }
 0x63b PF: > { %p2809_p4 = scmp.ge.s32.totalorder %s2973_s24, 2  ;;  %s2288_s26 = sand.u32 1, %s2961_s21  }
 0x63c   : > { %s2289_s29 = scalar_lea.sflag [#allocation4], %s2288_s26 }
 0x63d   : > { %p2806_p7 = pnand %p2809_p4, %p3058_p6 }
 0x63f   : > { %p2807_p8 = pneg %p2806_p7 }
 0x641   : > { %2956 = dma.done.wait (%p2807_p8), %s2289_s29, 128  }
 0x642   : > { %2958 = vsyncadd (%p2807_p8), %s2289_s29, 4294967168  ;;  %p17_p9 = scmp.ge.s32.totalorder %s3041_s27, 4   ;;  %s3930_s21 = smov %s2965_s22 }
 0x643   : > { %s3931_s22 = smov %s2969_s23  ;;  %s3932_s23 = smov %s3052_s30 }
 0x644   : > { %s3933_s24 = smov %s3041_s27  ;;  %19 = sbr.rel (!%p17_p9) target bundleno = 3 (0x3), region = 90 }
 0x649   :  { %2295 = vsyncpa [#allocation4], 1 }
 0x64a   :  { %2297 = vsyncpa [#allocation4 + $0x1], 1 }

</bundles_post_ra>
